<compile_context>
chip_gen: v6e
topology: v6e:2x2x1
jax: 0.10.0
libtpu: 0.0.40
codegen_flags: <defaults>
</compile_context>

<pallas_src>
import math

import jax
import jax.numpy as jnp
import numpy as np
from jax import lax
from jax.experimental import pallas as pl
from jax.experimental.pallas import tpu as pltpu

# ---- model hyper-parameters (norm_shape = [32]) ----
NUM_HIDDENS = 32
NUM_HEADS = 4
HEAD_DIM = NUM_HIDDENS // NUM_HEADS
FFN_NUM_HIDDENS = 64
LN_EPS = 1e-5

BATCH = 2
SEQ = 8          # decoder sequence length
SEQ_ENC = 8      # encoder sequence length

_NEG_INF = -1e6  # d2l masked_softmax fill value
_LANES = 128


def _layernorm(x, gamma, beta, eps=LN_EPS):
    mean = jnp.mean(x, axis=-1, keepdims=True)
    var = jnp.mean((x - mean) ** 2, axis=-1, keepdims=True)
    return (x - mean) * lax.rsqrt(var + eps) * gamma + beta


def _make_decoder_kernel(seq_q, seq_kv):
    """Fused decoder-block kernel; one grid step handles one batch element."""
    h, nh, hd, f = NUM_HIDDENS, NUM_HEADS, HEAD_DIM, FFN_NUM_HIDDENS
    log2_q = seq_q.bit_length() - 1
    log2_kv = seq_kv.bit_length() - 1
    assert (1 << log2_q) == seq_q and (1 << log2_kv) == seq_kv, (
        "sequence lengths must be powers of two (mask index math uses shifts)")
    assert _LANES % h == 0 and (seq_q * h) % _LANES == 0 and 4 * h == _LANES

    chunks = _LANES // h              # H-wide chunks per lane-dense output row
    rows_out = seq_q * h // _LANES    # lane-dense output rows per batch
    scale = 1.0 / math.sqrt(hd)

    # lane offsets inside the packed weight slab (rows 0:H)
    O_QKV1, O_Q2, O_KV2, O_O1, O_O2, O_W1 = 0, 3 * h, 4 * h, 6 * h, 7 * h, 8 * h
    bf16, f32 = jnp.bfloat16, jnp.float32

    def kernel(vl_ref, acts_ref, w_ref, vec_ref, out_ref):
        b = pl.program_id(0)
        x = acts_ref[0:seq_q, :]                      # (Sq,  H) decoder input
        enc = acts_ref[seq_q:seq_q + seq_kv, :]       # (Skv, H) encoder output

        # ---- masks on head-folded rows: row r = head*S + token ----
        rq = lax.broadcasted_iota(jnp.int32, (nh * seq_q, nh * seq_q), 0)
        rk = lax.broadcasted_iota(jnp.int32, (nh * seq_q, nh * seq_q), 1)
        self_mask = ((rq >> log2_q) == (rk >> log2_q)) & \
                    ((rk & (seq_q - 1)) <= (rq & (seq_q - 1)))

        cq = lax.broadcasted_iota(jnp.int32, (nh * seq_q, nh * seq_kv), 0)
        ck = lax.broadcasted_iota(jnp.int32, (nh * seq_q, nh * seq_kv), 1)
        cross_mask = ((cq >> log2_q) == (ck >> log2_kv)) & \
                     ((ck & (seq_kv - 1)) < vl_ref[b])

        def fold(t):
            # (n, H) -> (NH*n, HD), head-major rows (pure lane-slice + concat)
            return jnp.concatenate(
                [t[:, i * hd:(i + 1) * hd] for i in range(nh)], axis=0)

        def attend(q_full, k_full, v_full, wo_bf, mask, n_q):
            qf = fold(q_full * scale).astype(bf16)
            kf = fold(k_full).astype(bf16)
            vf = fold(v_full).astype(bf16)
            # one score matmul for ALL heads; cross-head pairs are masked out
            s = lax.dot_general(qf, kf, (((1,), (1,)), ((), ())),
                                preferred_element_type=f32)
            s = jnp.where(mask, s, _NEG_INF)
            m = jnp.max(s, axis=-1, keepdims=True)
            e = jnp.exp(s - m)
            p = e * pl.reciprocal(jnp.sum(e, axis=-1, keepdims=True), approx=True)
            ctx = jnp.dot(p.astype(bf16), vf, preferred_element_type=f32)
            # un-fold heads back to (n_q, H) concat-head layout, single Wo matmul
            ctx = jnp.concatenate(
                [ctx[i * n_q:(i + 1) * n_q, :] for i in range(nh)], axis=1)
            return jnp.dot(ctx.astype(bf16), wo_bf, preferred_element_type=f32)

        g1, b1 = vec_ref[0:1, 0:h], vec_ref[0:1, h:2 * h]
        g2, b2 = vec_ref[0:1, 2 * h:3 * h], vec_ref[0:1, 3 * h:4 * h]
        g3, b3 = vec_ref[1:2, 0:h], vec_ref[1:2, h:2 * h]
        bias2 = vec_ref[1:2, 2 * h:3 * h]
        bias1 = vec_ref[2:3, 0:f]

        # 1) masked self-attention (one packed (H,3H) projection) + AddNorm
        qkv = jnp.dot(x.astype(bf16), w_ref[0:h, O_QKV1:O_QKV1 + 3 * h],
                      preferred_element_type=f32)          # (Sq, 3H)
        x2 = attend(qkv[:, 0:h], qkv[:, h:2 * h], qkv[:, 2 * h:3 * h],
                    w_ref[0:h, O_O1:O_O1 + h], self_mask, seq_q)
        y = _layernorm(x2 + x, g1, b1)

        # 2) encoder-decoder cross-attention + AddNorm
        q2 = jnp.dot(y.astype(bf16), w_ref[0:h, O_Q2:O_Q2 + h],
                     preferred_element_type=f32)            # (Sq, H)
        kv2 = jnp.dot(enc.astype(bf16), w_ref[0:h, O_KV2:O_KV2 + 2 * h],
                      preferred_element_type=f32)           # (Skv, 2H)
        y2 = attend(q2, kv2[:, 0:h], kv2[:, h:2 * h],
                    w_ref[0:h, O_O2:O_O2 + h], cross_mask, seq_q)
        z = _layernorm(y2 + y, g2, b2)

        # 3) position-wise FFN + AddNorm
        h1 = jnp.maximum(
            jnp.dot(z.astype(bf16), w_ref[0:h, O_W1:O_W1 + f],
                    preferred_element_type=f32) + bias1, 0.0)
        ffn = jnp.dot(h1.astype(bf16), w_ref[h:h + f, 0:h],
                      preferred_element_type=f32) + bias2
        res = _layernorm(ffn + z, g3, b3)                   # (Sq, H) f32

        # lane-dense store: (Sq, H) -> (Sq*H/128, 128); wrapper un-permutes.
        out_ref[...] = jnp.concatenate(
            [res[j * rows_out:(j + 1) * rows_out, :] for j in range(chunks)],
            axis=1).astype(out_ref.dtype)

    return kernel


def decoder_block(x, enc_outputs, enc_valid_lens, params):
    B, S, H = x.shape
    S_enc = enc_outputs.shape[1]
    F = params["w1"].shape[1]
    assert H == NUM_HIDDENS and F == FFN_NUM_HIDDENS

    # ---- wrapper-side packing (pure layout work, outside the kernel) ----
    # activations slab: decoder tokens on top of encoder tokens, per batch
    acts = jnp.concatenate([x, enc_outputs], axis=1).astype(jnp.float32)

    # one bf16 weight slab, standard (K,N) orientation:
    #   rows 0:H , lanes [0,3H)=Wq1|Wk1|Wv1  [3H,4H)=Wq2  [4H,6H)=Wk2|Wv2
    #                     [6H,7H)=Wo1  [7H,8H)=Wo2  [8H,8H+F)=W1
    #   rows H:H+F, lanes [0,H) = W2
    w_top = jnp.concatenate(
        [params["wq1"], params["wk1"], params["wv1"],
         params["wq2"], params["wk2"], params["wv2"],
         params["wo1"], params["wo2"], params["w1"]], axis=1)
    wslab = jnp.zeros((H + F, 8 * H + F), jnp.float32)
    wslab = wslab.at[0:H, :].set(w_top)
    wslab = wslab.at[H:H + F, 0:H].set(params["w2"])
    wslab = wslab.astype(jnp.bfloat16)          # bf16 MXU operands, half the DMA

    # one (8,128) f32 vector slab: LN gammas/betas + FFN biases
    zeros = lambda n: jnp.zeros((n,), jnp.float32)
    vec0 = jnp.concatenate([params["g1"], params["b1"], params["g2"], params["b2"]])
    vec1 = jnp.concatenate([params["g3"], params["b3"], params["bf2"],
                            zeros(_LANES - 3 * H)])
    vec2 = jnp.concatenate([params["bf1"], zeros(_LANES - F)])
    vecs = jnp.stack([vec0, vec1, vec2] + [zeros(_LANES)] * 5, axis=0)

    R = S * H // _LANES          # lane-dense output rows per batch
    C = _LANES // H              # H-wide chunks per output row

    kernel = _make_decoder_kernel(S, S_enc)
    out = pl.pallas_call(
        kernel,
        out_shape=jax.ShapeDtypeStruct((B, R, _LANES), jnp.float32),
        grid_spec=pltpu.PrefetchScalarGridSpec(
            num_scalar_prefetch=1,           # enc_valid_lens -> SMEM
            grid=(B,),
            in_specs=[
                pl.BlockSpec((pl.Squeezed(), S + S_enc, H),
                             lambda b, vl: (b, 0, 0)),
                pl.BlockSpec((H + F, 8 * H + F), lambda b, vl: (0, 0)),
                pl.BlockSpec((8, _LANES), lambda b, vl: (0, 0)),
            ],
            out_specs=pl.BlockSpec((pl.Squeezed(), R, _LANES),
                                   lambda b, vl: (b, 0, 0)),
        ),
        compiler_params=pltpu.CompilerParams(
            dimension_semantics=("parallel",)),   # both TCs on v7x
    )(enc_valid_lens.astype(jnp.int32), acts, wslab, vecs)

    # un-permute the lane-dense slab back to (B, S, H)
    return out.reshape(B, R, C, H).transpose(0, 2, 1, 3).reshape(B, S, H)


# ----------------------------- pure-JAX reference -----------------------------
def decoder_block_ref(x, enc_outputs, enc_valid_lens, params):
    B, S, H = x.shape
    hp = lax.Precision.HIGHEST
    mm = lambda a, b: jnp.matmul(a, b, precision=hp)

    def mha(q_in, kv_in, wq, wk, wv, wo, valid_lens, per_query):
        S_q, S_k = q_in.shape[1], kv_in.shape[1]
        q, k, v = mm(q_in, wq), mm(kv_in, wk), mm(kv_in, wv)
        split = lambda t, L: t.reshape(B, L, NUM_HEADS, HEAD_DIM).transpose(0, 2, 1, 3)
        qh, kh, vh = split(q, S_q), split(k, S_k), split(v, S_k)
        scores = jnp.einsum("bnqd,bnkd->bnqk", qh, kh,
                            precision=hp) / math.sqrt(HEAD_DIM)
        key_idx = jnp.arange(S_k)
        if per_query:   # valid_lens (B, S_q)
            mask = key_idx[None, None, None, :] < valid_lens[:, None, :, None]
        else:           # valid_lens (B,)
            mask = key_idx[None, None, None, :] < valid_lens[:, None, None, None]
        scores = jnp.where(mask, scores, _NEG_INF)
        attn = jax.nn.softmax(scores, axis=-1)
        ctx = jnp.einsum("bnqk,bnkd->bnqd", attn, vh, precision=hp)
        ctx = ctx.transpose(0, 2, 1, 3).reshape(B, S_q, H)
        return mm(ctx, wo)

    def ln(t, g, b):
        m = jnp.mean(t, axis=-1, keepdims=True)
        v = jnp.mean((t - m) ** 2, axis=-1, keepdims=True)
        return (t - m) / jnp.sqrt(v + LN_EPS) * g + b

    dec_valid_lens = jnp.tile(jnp.arange(1, S + 1)[None, :], (B, 1))
    x2 = mha(x, x, params["wq1"], params["wk1"], params["wv1"], params["wo1"],
             dec_valid_lens, True)
    y = ln(x2 + x, params["g1"], params["b1"])
    y2 = mha(y, enc_outputs, params["wq2"], params["wk2"], params["wv2"],
             params["wo2"], enc_valid_lens, False)
    z = ln(y2 + y, params["g2"], params["b2"])
    h1 = jnp.maximum(mm(z, params["w1"]) + params["bf1"], 0.0)
    f = mm(h1, params["w2"]) + params["bf2"]
    return ln(f + z, params["g3"], params["b3"])


def init_params(key, H=NUM_HIDDENS, F=FFN_NUM_HIDDENS):
    ks = jax.random.split(key, 12)
    s = 0.1
    p = {}
    for i, n in enumerate(("wq1", "wk1", "wv1", "wo1",
                           "wq2", "wk2", "wv2", "wo2")):
        p[n] = s * jax.random.normal(ks[i], (H, H), jnp.float32)
    p["w1"] = s * jax.random.normal(ks[8], (H, F), jnp.float32)
    p["bf1"] = s * jax.random.normal(ks[9], (F,), jnp.float32)
    p["w2"] = s * jax.random.normal(ks[10], (F, H), jnp.float32)
    p["bf2"] = s * jax.random.normal(ks[11], (H,), jnp.float32)
    for j in (1, 2, 3):
        p[f"g{j}"] = jnp.ones((H,), jnp.float32)
        p[f"b{j}"] = jnp.zeros((H,), jnp.float32)
    return p


if __name__ == "__main__":
    key = jax.random.PRNGKey(0)
    kx, ke, kp = jax.random.split(key, 3)

    x = jax.random.normal(kx, (BATCH, SEQ, NUM_HIDDENS), jnp.float32)
    enc_outputs = jax.random.normal(ke, (BATCH, SEQ_ENC, NUM_HIDDENS), jnp.float32)
    enc_valid_lens = jnp.array([SEQ_ENC, 5], dtype=jnp.int32)
    params = init_params(kp)

    out = decoder_block(x, enc_outputs, enc_valid_lens, params)
    out = jax.block_until_ready(out)

    ref = decoder_block_ref(x, enc_outputs, enc_valid_lens, params)
    # tolerance loosened (4e-2) because the kernel uses bf16 MXU operands with
    # f32 accumulation, while the reference is full-f32 HIGHEST precision.
    np.testing.assert_allclose(np.asarray(out), np.asarray(ref),
                               rtol=4e-2, atol=4e-2)
    print("KERNEL_OK")
</pallas_src>

<mosaic_0001>
module attributes {stable_mosaic.version = 11 : i64} {
  func.func @kernel(%arg0: i32, %arg1: memref<2xi32, #tpu.memory_space<smem>>, %arg2: memref<1x16x32xf32, #tpu.memory_space<vmem>>, %arg3: memref<96x320xbf16, #tpu.memory_space<vmem>>, %arg4: memref<8x128xf32, #tpu.memory_space<vmem>>, %arg5: memref<1x2x128xf32, #tpu.memory_space<vmem>>) attributes {dimension_semantics = [#tpu.dimension_semantics<parallel>], iteration_bounds = array<i64: 2>, scalar_prefetch = 1 : i64, scratch_operands = 0 : i64, tpu.core_type = #tpu.core_type<tc>, window_params = [{transform_indices = @transform_0, window_bounds = array<i64: 1, 16, 32>}, {pipeline_mode = #tpu.pipeline_mode<synchronous>, transform_indices = @transform_1, window_bounds = array<i64: 96, 320>}, {pipeline_mode = #tpu.pipeline_mode<synchronous>, transform_indices = @transform_2, window_bounds = array<i64: 8, 128>}, {transform_indices = @transform_3, window_bounds = array<i64: 1, 2, 128>}]} {
    %c0 = arith.constant 0 : index
    %c0_0 = arith.constant 0 : index
    %c0_1 = arith.constant 0 : index
    %0 = vector.load %arg2[%c0, %c0_0, %c0_1] : memref<1x16x32xf32, #tpu.memory_space<vmem>>, vector<1x8x32xf32>
    %1 = vector.shape_cast %0 : vector<1x8x32xf32> to vector<8x32xf32>
    %c0_2 = arith.constant 0 : index
    %c8 = arith.constant 8 : index
    %c0_3 = arith.constant 0 : index
    %2 = vector.load %arg2[%c0_2, %c8, %c0_3] : memref<1x16x32xf32, #tpu.memory_space<vmem>>, vector<1x8x32xf32>
    %3 = vector.shape_cast %2 : vector<1x8x32xf32> to vector<8x32xf32>
    %4 = tpu.iota {dimensions = array<i32: 0>} : vector<32x32xi32>
    %5 = tpu.iota {dimensions = array<i32: 1>} : vector<32x32xi32>
    %c3_i32 = arith.constant 3 : i32
    %6 = vector.broadcast %c3_i32 : i32 to vector<32x32xi32>
    %7 = arith.shrsi %4, %6 : vector<32x32xi32>
    %c3_i32_4 = arith.constant 3 : i32
    %8 = vector.broadcast %c3_i32_4 : i32 to vector<32x32xi32>
    %9 = arith.shrsi %5, %8 : vector<32x32xi32>
    %10 = arith.cmpi eq, %7, %9 : vector<32x32xi32>
    %c7_i32 = arith.constant 7 : i32
    %11 = vector.broadcast %c7_i32 : i32 to vector<32x32xi32>
    %12 = arith.andi %5, %11 : vector<32x32xi32>
    %c7_i32_5 = arith.constant 7 : i32
    %13 = vector.broadcast %c7_i32_5 : i32 to vector<32x32xi32>
    %14 = arith.andi %4, %13 : vector<32x32xi32>
    %15 = arith.cmpi sle, %12, %14 : vector<32x32xi32>
    %16 = arith.andi %10, %15 : vector<32x32xi1>
    %17 = tpu.iota {dimensions = array<i32: 0>} : vector<32x32xi32>
    %18 = tpu.iota {dimensions = array<i32: 1>} : vector<32x32xi32>
    %c3_i32_6 = arith.constant 3 : i32
    %19 = vector.broadcast %c3_i32_6 : i32 to vector<32x32xi32>
    %20 = arith.shrsi %17, %19 : vector<32x32xi32>
    %c3_i32_7 = arith.constant 3 : i32
    %21 = vector.broadcast %c3_i32_7 : i32 to vector<32x32xi32>
    %22 = arith.shrsi %18, %21 : vector<32x32xi32>
    %23 = arith.cmpi eq, %20, %22 : vector<32x32xi32>
    %c7_i32_8 = arith.constant 7 : i32
    %24 = vector.broadcast %c7_i32_8 : i32 to vector<32x32xi32>
    %25 = arith.andi %18, %24 : vector<32x32xi32>
    %26 = arith.index_cast %arg0 : i32 to index
    %27 = memref.load %arg1[%26] : memref<2xi32, #tpu.memory_space<smem>>
    %28 = vector.broadcast %27 : i32 to vector<32x32xi32>
    %29 = arith.cmpi slt, %25, %28 : vector<32x32xi32>
    %30 = arith.andi %23, %29 : vector<32x32xi1>
    %c0_9 = arith.constant 0 : index
    %c0_10 = arith.constant 0 : index
    %31 = vector.load %arg4[%c0_9, %c0_10] : memref<8x128xf32, #tpu.memory_space<vmem>>, vector<1x32xf32>
    %c0_11 = arith.constant 0 : index
    %c32 = arith.constant 32 : index
    %32 = vector.load %arg4[%c0_11, %c32] : memref<8x128xf32, #tpu.memory_space<vmem>>, vector<1x32xf32>
    %c0_12 = arith.constant 0 : index
    %c64 = arith.constant 64 : index
    %33 = vector.load %arg4[%c0_12, %c64] : memref<8x128xf32, #tpu.memory_space<vmem>>, vector<1x32xf32>
    %c0_13 = arith.constant 0 : index
    %c96 = arith.constant 96 : index
    %34 = vector.load %arg4[%c0_13, %c96] : memref<8x128xf32, #tpu.memory_space<vmem>>, vector<1x32xf32>
    %c1 = arith.constant 1 : index
    %c0_14 = arith.constant 0 : index
    %35 = vector.load %arg4[%c1, %c0_14] : memref<8x128xf32, #tpu.memory_space<vmem>>, vector<1x32xf32>
    %c1_15 = arith.constant 1 : index
    %c32_16 = arith.constant 32 : index
    %36 = vector.load %arg4[%c1_15, %c32_16] : memref<8x128xf32, #tpu.memory_space<vmem>>, vector<1x32xf32>
    %c1_17 = arith.constant 1 : index
    %c64_18 = arith.constant 64 : index
    %37 = vector.load %arg4[%c1_17, %c64_18] : memref<8x128xf32, #tpu.memory_space<vmem>>, vector<1x32xf32>
    %c2 = arith.constant 2 : index
    %c0_19 = arith.constant 0 : index
    %38 = vector.load %arg4[%c2, %c0_19] : memref<8x128xf32, #tpu.memory_space<vmem>>, vector<1x64xf32>
    %39 = arith.truncf %1 : vector<8x32xf32> to vector<8x32xbf16>
    %c0_20 = arith.constant 0 : index
    %c0_21 = arith.constant 0 : index
    %40 = vector.load %arg3[%c0_20, %c0_21] : memref<96x320xbf16, #tpu.memory_space<vmem>>, vector<32x96xbf16>
    %cst = arith.constant dense<0.000000e+00> : vector<8x96xf32>
    %41 = tpu.matmul %39, %40, %cst {dimension_numbers = #tpu.dot_dimension_numbers<[1], [0], [0], [1], [0, 0, 1, 1], [], []>} : vector<8x32xbf16>, vector<32x96xbf16>, vector<8x96xf32> -> vector<8x96xf32>
    %42 = vector.extract_strided_slice %41 {offsets = [0, 0], sizes = [8, 32], strides = [1, 1]} : vector<8x96xf32> to vector<8x32xf32>
    %43 = vector.extract_strided_slice %41 {offsets = [0, 32], sizes = [8, 32], strides = [1, 1]} : vector<8x96xf32> to vector<8x32xf32>
    %44 = vector.extract_strided_slice %41 {offsets = [0, 64], sizes = [8, 32], strides = [1, 1]} : vector<8x96xf32> to vector<8x32xf32>
    %c0_22 = arith.constant 0 : index
    %c192 = arith.constant 192 : index
    %45 = vector.load %arg3[%c0_22, %c192] : memref<96x320xbf16, #tpu.memory_space<vmem>>, vector<32x32xbf16>
    %cst_23 = arith.constant 0.353553385 : f32
    %46 = vector.broadcast %cst_23 : f32 to vector<8x32xf32>
    %47 = arith.mulf %42, %46 : vector<8x32xf32>
    %48 = vector.extract_strided_slice %47 {offsets = [0, 0], sizes = [8, 8], strides = [1, 1]} : vector<8x32xf32> to vector<8x8xf32>
    %49 = vector.extract_strided_slice %47 {offsets = [0, 8], sizes = [8, 8], strides = [1, 1]} : vector<8x32xf32> to vector<8x8xf32>
    %50 = vector.extract_strided_slice %47 {offsets = [0, 16], sizes = [8, 8], strides = [1, 1]} : vector<8x32xf32> to vector<8x8xf32>
    %51 = vector.extract_strided_slice %47 {offsets = [0, 24], sizes = [8, 8], strides = [1, 1]} : vector<8x32xf32> to vector<8x8xf32>
    %52 = tpu.concatenate %48, %49, %50, %51 in 0 : vector<8x8xf32>, vector<8x8xf32>, vector<8x8xf32>, vector<8x8xf32> -> vector<32x8xf32>
    %53 = arith.truncf %52 : vector<32x8xf32> to vector<32x8xbf16>
    %54 = vector.extract_strided_slice %43 {offsets = [0, 0], sizes = [8, 8], strides = [1, 1]} : vector<8x32xf32> to vector<8x8xf32>
    %55 = vector.extract_strided_slice %43 {offsets = [0, 8], sizes = [8, 8], strides = [1, 1]} : vector<8x32xf32> to vector<8x8xf32>
    %56 = vector.extract_strided_slice %43 {offsets = [0, 16], sizes = [8, 8], strides = [1, 1]} : vector<8x32xf32> to vector<8x8xf32>
    %57 = vector.extract_strided_slice %43 {offsets = [0, 24], sizes = [8, 8], strides = [1, 1]} : vector<8x32xf32> to vector<8x8xf32>
    %58 = tpu.concatenate %54, %55, %56, %57 in 0 : vector<8x8xf32>, vector<8x8xf32>, vector<8x8xf32>, vector<8x8xf32> -> vector<32x8xf32>
    %59 = arith.truncf %58 : vector<32x8xf32> to vector<32x8xbf16>
    %60 = vector.extract_strided_slice %44 {offsets = [0, 0], sizes = [8, 8], strides = [1, 1]} : vector<8x32xf32> to vector<8x8xf32>
    %61 = vector.extract_strided_slice %44 {offsets = [0, 8], sizes = [8, 8], strides = [1, 1]} : vector<8x32xf32> to vector<8x8xf32>
    %62 = vector.extract_strided_slice %44 {offsets = [0, 16], sizes = [8, 8], strides = [1, 1]} : vector<8x32xf32> to vector<8x8xf32>
    %63 = vector.extract_strided_slice %44 {offsets = [0, 24], sizes = [8, 8], strides = [1, 1]} : vector<8x32xf32> to vector<8x8xf32>
    %64 = tpu.concatenate %60, %61, %62, %63 in 0 : vector<8x8xf32>, vector<8x8xf32>, vector<8x8xf32>, vector<8x8xf32> -> vector<32x8xf32>
    %65 = arith.truncf %64 : vector<32x8xf32> to vector<32x8xbf16>
    %cst_24 = arith.constant dense<0.000000e+00> : vector<32x32xf32>
    %66 = tpu.matmul %53, %59, %cst_24 {dimension_numbers = #tpu.dot_dimension_numbers<[1], [1], [0], [0], [0, 0, 1, 0], [], []>} : vector<32x8xbf16>, vector<32x8xbf16>, vector<32x32xf32> -> vector<32x32xf32>
    %cst_25 = arith.constant -1.000000e+06 : f32
    %67 = vector.broadcast %cst_25 : f32 to vector<32x32xf32>
    %68 = arith.select %16, %66, %67 : vector<32x32xi1>, vector<32x32xf32>
    %cst_26 = arith.constant dense<0xFF800000> : vector<32xf32>
    %69 = vector.multi_reduction <maximumf>, %68, %cst_26 [1] : vector<32x32xf32> to vector<32xf32>
    %70 = vector.shape_cast %69 : vector<32xf32> to vector<32x1xf32>
    %71 = vector.broadcast %70 : vector<32x1xf32> to vector<32x32xf32>
    %72 = arith.subf %68, %71 : vector<32x32xf32>
    %73 = math.exp %72 : vector<32x32xf32>
    %cst_27 = arith.constant dense<0.000000e+00> : vector<32xf32>
    %74 = vector.multi_reduction <add>, %73, %cst_27 [1] : vector<32x32xf32> to vector<32xf32>
    %75 = vector.shape_cast %74 : vector<32xf32> to vector<32x1xf32>
    %76 = tpu.reciprocal %75 {approx = true} : vector<32x1xf32> -> vector<32x1xf32>
    %77 = vector.broadcast %76 : vector<32x1xf32> to vector<32x32xf32>
    %78 = arith.mulf %73, %77 : vector<32x32xf32>
    %79 = arith.truncf %78 : vector<32x32xf32> to vector<32x32xbf16>
    %cst_28 = arith.constant dense<0.000000e+00> : vector<32x8xf32>
    %80 = tpu.matmul %79, %65, %cst_28 {dimension_numbers = #tpu.dot_dimension_numbers<[1], [0], [0], [1], [0, 0, 1, 1], [], []>} : vector<32x32xbf16>, vector<32x8xbf16>, vector<32x8xf32> -> vector<32x8xf32>
    %81 = vector.extract_strided_slice %80 {offsets = [0, 0], sizes = [8, 8], strides = [1, 1]} : vector<32x8xf32> to vector<8x8xf32>
    %82 = vector.extract_strided_slice %80 {offsets = [8, 0], sizes = [8, 8], strides = [1, 1]} : vector<32x8xf32> to vector<8x8xf32>
    %83 = vector.extract_strided_slice %80 {offsets = [16, 0], sizes = [8, 8], strides = [1, 1]} : vector<32x8xf32> to vector<8x8xf32>
    %84 = vector.extract_strided_slice %80 {offsets = [24, 0], sizes = [8, 8], strides = [1, 1]} : vector<32x8xf32> to vector<8x8xf32>
    %85 = tpu.concatenate %81, %82, %83, %84 in 1 : vector<8x8xf32>, vector<8x8xf32>, vector<8x8xf32>, vector<8x8xf32> -> vector<8x32xf32>
    %86 = arith.truncf %85 : vector<8x32xf32> to vector<8x32xbf16>
    %cst_29 = arith.constant dense<0.000000e+00> : vector<8x32xf32>
    %87 = tpu.matmul %86, %45, %cst_29 {dimension_numbers = #tpu.dot_dimension_numbers<[1], [0], [0], [1], [0, 0, 1, 1], [], []>} : vector<8x32xbf16>, vector<32x32xbf16>, vector<8x32xf32> -> vector<8x32xf32>
    %88 = arith.addf %87, %1 : vector<8x32xf32>
    %cst_30 = arith.constant dense<0.000000e+00> : vector<8xf32>
    %89 = vector.multi_reduction <add>, %88, %cst_30 [1] : vector<8x32xf32> to vector<8xf32>
    %90 = vector.shape_cast %89 : vector<8xf32> to vector<8x1xf32>
    %cst_31 = arith.constant 3.200000e+01 : f32
    %91 = vector.broadcast %cst_31 : f32 to vector<8x1xf32>
    %92 = arith.divf %90, %91 : vector<8x1xf32>
    %93 = vector.broadcast %92 : vector<8x1xf32> to vector<8x32xf32>
    %94 = arith.subf %88, %93 : vector<8x32xf32>
    %95 = arith.mulf %94, %94 : vector<8x32xf32>
    %cst_32 = arith.constant dense<0.000000e+00> : vector<8xf32>
    %96 = vector.multi_reduction <add>, %95, %cst_32 [1] : vector<8x32xf32> to vector<8xf32>
    %97 = vector.shape_cast %96 : vector<8xf32> to vector<8x1xf32>
    %cst_33 = arith.constant 3.200000e+01 : f32
    %98 = vector.broadcast %cst_33 : f32 to vector<8x1xf32>
    %99 = arith.divf %97, %98 : vector<8x1xf32>
    %100 = vector.broadcast %92 : vector<8x1xf32> to vector<8x32xf32>
    %101 = arith.subf %88, %100 : vector<8x32xf32>
    %cst_34 = arith.constant 9.99999974E-6 : f32
    %102 = vector.broadcast %cst_34 : f32 to vector<8x1xf32>
    %103 = arith.addf %99, %102 : vector<8x1xf32>
    %104 = math.rsqrt %103 : vector<8x1xf32>
    %105 = vector.broadcast %104 : vector<8x1xf32> to vector<8x32xf32>
    %106 = arith.mulf %101, %105 : vector<8x32xf32>
    %107 = vector.broadcast %31 : vector<1x32xf32> to vector<8x32xf32>
    %108 = arith.mulf %106, %107 : vector<8x32xf32>
    %109 = vector.broadcast %32 : vector<1x32xf32> to vector<8x32xf32>
    %110 = arith.addf %108, %109 : vector<8x32xf32>
    %111 = arith.truncf %110 : vector<8x32xf32> to vector<8x32xbf16>
    %c0_35 = arith.constant 0 : index
    %c96_36 = arith.constant 96 : index
    %112 = vector.load %arg3[%c0_35, %c96_36] : memref<96x320xbf16, #tpu.memory_space<vmem>>, vector<32x32xbf16>
    %cst_37 = arith.constant dense<0.000000e+00> : vector<8x32xf32>
    %113 = tpu.matmul %111, %112, %cst_37 {dimension_numbers = #tpu.dot_dimension_numbers<[1], [0], [0], [1], [0, 0, 1, 1], [], []>} : vector<8x32xbf16>, vector<32x32xbf16>, vector<8x32xf32> -> vector<8x32xf32>
    %114 = arith.truncf %3 : vector<8x32xf32> to vector<8x32xbf16>
    %c0_38 = arith.constant 0 : index
    %c128 = arith.constant 128 : index
    %115 = vector.load %arg3[%c0_38, %c128] : memref<96x320xbf16, #tpu.memory_space<vmem>>, vector<32x64xbf16>
    %cst_39 = arith.constant dense<0.000000e+00> : vector<8x64xf32>
    %116 = tpu.matmul %114, %115, %cst_39 {dimension_numbers = #tpu.dot_dimension_numbers<[1], [0], [0], [1], [0, 0, 1, 1], [], []>} : vector<8x32xbf16>, vector<32x64xbf16>, vector<8x64xf32> -> vector<8x64xf32>
    %117 = vector.extract_strided_slice %116 {offsets = [0, 0], sizes = [8, 32], strides = [1, 1]} : vector<8x64xf32> to vector<8x32xf32>
    %118 = vector.extract_strided_slice %116 {offsets = [0, 32], sizes = [8, 32], strides = [1, 1]} : vector<8x64xf32> to vector<8x32xf32>
    %c0_40 = arith.constant 0 : index
    %c224 = arith.constant 224 : index
    %119 = vector.load %arg3[%c0_40, %c224] : memref<96x320xbf16, #tpu.memory_space<vmem>>, vector<32x32xbf16>
    %cst_41 = arith.constant 0.353553385 : f32
    %120 = vector.broadcast %cst_41 : f32 to vector<8x32xf32>
    %121 = arith.mulf %113, %120 : vector<8x32xf32>
    %122 = vector.extract_strided_slice %121 {offsets = [0, 0], sizes = [8, 8], strides = [1, 1]} : vector<8x32xf32> to vector<8x8xf32>
    %123 = vector.extract_strided_slice %121 {offsets = [0, 8], sizes = [8, 8], strides = [1, 1]} : vector<8x32xf32> to vector<8x8xf32>
    %124 = vector.extract_strided_slice %121 {offsets = [0, 16], sizes = [8, 8], strides = [1, 1]} : vector<8x32xf32> to vector<8x8xf32>
    %125 = vector.extract_strided_slice %121 {offsets = [0, 24], sizes = [8, 8], strides = [1, 1]} : vector<8x32xf32> to vector<8x8xf32>
    %126 = tpu.concatenate %122, %123, %124, %125 in 0 : vector<8x8xf32>, vector<8x8xf32>, vector<8x8xf32>, vector<8x8xf32> -> vector<32x8xf32>
    %127 = arith.truncf %126 : vector<32x8xf32> to vector<32x8xbf16>
    %128 = vector.extract_strided_slice %117 {offsets = [0, 0], sizes = [8, 8], strides = [1, 1]} : vector<8x32xf32> to vector<8x8xf32>
    %129 = vector.extract_strided_slice %117 {offsets = [0, 8], sizes = [8, 8], strides = [1, 1]} : vector<8x32xf32> to vector<8x8xf32>
    %130 = vector.extract_strided_slice %117 {offsets = [0, 16], sizes = [8, 8], strides = [1, 1]} : vector<8x32xf32> to vector<8x8xf32>
    %131 = vector.extract_strided_slice %117 {offsets = [0, 24], sizes = [8, 8], strides = [1, 1]} : vector<8x32xf32> to vector<8x8xf32>
    %132 = tpu.concatenate %128, %129, %130, %131 in 0 : vector<8x8xf32>, vector<8x8xf32>, vector<8x8xf32>, vector<8x8xf32> -> vector<32x8xf32>
    %133 = arith.truncf %132 : vector<32x8xf32> to vector<32x8xbf16>
    %134 = vector.extract_strided_slice %118 {offsets = [0, 0], sizes = [8, 8], strides = [1, 1]} : vector<8x32xf32> to vector<8x8xf32>
    %135 = vector.extract_strided_slice %118 {offsets = [0, 8], sizes = [8, 8], strides = [1, 1]} : vector<8x32xf32> to vector<8x8xf32>
    %136 = vector.extract_strided_slice %118 {offsets = [0, 16], sizes = [8, 8], strides = [1, 1]} : vector<8x32xf32> to vector<8x8xf32>
    %137 = vector.extract_strided_slice %118 {offsets = [0, 24], sizes = [8, 8], strides = [1, 1]} : vector<8x32xf32> to vector<8x8xf32>
    %138 = tpu.concatenate %134, %135, %136, %137 in 0 : vector<8x8xf32>, vector<8x8xf32>, vector<8x8xf32>, vector<8x8xf32> -> vector<32x8xf32>
    %139 = arith.truncf %138 : vector<32x8xf32> to vector<32x8xbf16>
    %cst_42 = arith.constant dense<0.000000e+00> : vector<32x32xf32>
    %140 = tpu.matmul %127, %133, %cst_42 {dimension_numbers = #tpu.dot_dimension_numbers<[1], [1], [0], [0], [0, 0, 1, 0], [], []>} : vector<32x8xbf16>, vector<32x8xbf16>, vector<32x32xf32> -> vector<32x32xf32>
    %cst_43 = arith.constant -1.000000e+06 : f32
    %141 = vector.broadcast %cst_43 : f32 to vector<32x32xf32>
    %142 = arith.select %30, %140, %141 : vector<32x32xi1>, vector<32x32xf32>
    %cst_44 = arith.constant dense<0xFF800000> : vector<32xf32>
    %143 = vector.multi_reduction <maximumf>, %142, %cst_44 [1] : vector<32x32xf32> to vector<32xf32>
    %144 = vector.shape_cast %143 : vector<32xf32> to vector<32x1xf32>
    %145 = vector.broadcast %144 : vector<32x1xf32> to vector<32x32xf32>
    %146 = arith.subf %142, %145 : vector<32x32xf32>
    %147 = math.exp %146 : vector<32x32xf32>
    %cst_45 = arith.constant dense<0.000000e+00> : vector<32xf32>
    %148 = vector.multi_reduction <add>, %147, %cst_45 [1] : vector<32x32xf32> to vector<32xf32>
    %149 = vector.shape_cast %148 : vector<32xf32> to vector<32x1xf32>
    %150 = tpu.reciprocal %149 {approx = true} : vector<32x1xf32> -> vector<32x1xf32>
    %151 = vector.broadcast %150 : vector<32x1xf32> to vector<32x32xf32>
    %152 = arith.mulf %147, %151 : vector<32x32xf32>
    %153 = arith.truncf %152 : vector<32x32xf32> to vector<32x32xbf16>
    %cst_46 = arith.constant dense<0.000000e+00> : vector<32x8xf32>
    %154 = tpu.matmul %153, %139, %cst_46 {dimension_numbers = #tpu.dot_dimension_numbers<[1], [0], [0], [1], [0, 0, 1, 1], [], []>} : vector<32x32xbf16>, vector<32x8xbf16>, vector<32x8xf32> -> vector<32x8xf32>
    %155 = vector.extract_strided_slice %154 {offsets = [0, 0], sizes = [8, 8], strides = [1, 1]} : vector<32x8xf32> to vector<8x8xf32>
    %156 = vector.extract_strided_slice %154 {offsets = [8, 0], sizes = [8, 8], strides = [1, 1]} : vector<32x8xf32> to vector<8x8xf32>
    %157 = vector.extract_strided_slice %154 {offsets = [16, 0], sizes = [8, 8], strides = [1, 1]} : vector<32x8xf32> to vector<8x8xf32>
    %158 = vector.extract_strided_slice %154 {offsets = [24, 0], sizes = [8, 8], strides = [1, 1]} : vector<32x8xf32> to vector<8x8xf32>
    %159 = tpu.concatenate %155, %156, %157, %158 in 1 : vector<8x8xf32>, vector<8x8xf32>, vector<8x8xf32>, vector<8x8xf32> -> vector<8x32xf32>
    %160 = arith.truncf %159 : vector<8x32xf32> to vector<8x32xbf16>
    %cst_47 = arith.constant dense<0.000000e+00> : vector<8x32xf32>
    %161 = tpu.matmul %160, %119, %cst_47 {dimension_numbers = #tpu.dot_dimension_numbers<[1], [0], [0], [1], [0, 0, 1, 1], [], []>} : vector<8x32xbf16>, vector<32x32xbf16>, vector<8x32xf32> -> vector<8x32xf32>
    %162 = arith.addf %161, %110 : vector<8x32xf32>
    %cst_48 = arith.constant dense<0.000000e+00> : vector<8xf32>
    %163 = vector.multi_reduction <add>, %162, %cst_48 [1] : vector<8x32xf32> to vector<8xf32>
    %164 = vector.shape_cast %163 : vector<8xf32> to vector<8x1xf32>
    %cst_49 = arith.constant 3.200000e+01 : f32
    %165 = vector.broadcast %cst_49 : f32 to vector<8x1xf32>
    %166 = arith.divf %164, %165 : vector<8x1xf32>
    %167 = vector.broadcast %166 : vector<8x1xf32> to vector<8x32xf32>
    %168 = arith.subf %162, %167 : vector<8x32xf32>
    %169 = arith.mulf %168, %168 : vector<8x32xf32>
    %cst_50 = arith.constant dense<0.000000e+00> : vector<8xf32>
    %170 = vector.multi_reduction <add>, %169, %cst_50 [1] : vector<8x32xf32> to vector<8xf32>
    %171 = vector.shape_cast %170 : vector<8xf32> to vector<8x1xf32>
    %cst_51 = arith.constant 3.200000e+01 : f32
    %172 = vector.broadcast %cst_51 : f32 to vector<8x1xf32>
    %173 = arith.divf %171, %172 : vector<8x1xf32>
    %174 = vector.broadcast %166 : vector<8x1xf32> to vector<8x32xf32>
    %175 = arith.subf %162, %174 : vector<8x32xf32>
    %cst_52 = arith.constant 9.99999974E-6 : f32
    %176 = vector.broadcast %cst_52 : f32 to vector<8x1xf32>
    %177 = arith.addf %173, %176 : vector<8x1xf32>
    %178 = math.rsqrt %177 : vector<8x1xf32>
    %179 = vector.broadcast %178 : vector<8x1xf32> to vector<8x32xf32>
    %180 = arith.mulf %175, %179 : vector<8x32xf32>
    %181 = vector.broadcast %33 : vector<1x32xf32> to vector<8x32xf32>
    %182 = arith.mulf %180, %181 : vector<8x32xf32>
    %183 = vector.broadcast %34 : vector<1x32xf32> to vector<8x32xf32>
    %184 = arith.addf %182, %183 : vector<8x32xf32>
    %185 = arith.truncf %184 : vector<8x32xf32> to vector<8x32xbf16>
    %c0_53 = arith.constant 0 : index
    %c256 = arith.constant 256 : index
    %186 = vector.load %arg3[%c0_53, %c256] : memref<96x320xbf16, #tpu.memory_space<vmem>>, vector<32x64xbf16>
    %cst_54 = arith.constant dense<0.000000e+00> : vector<8x64xf32>
    %187 = tpu.matmul %185, %186, %cst_54 {dimension_numbers = #tpu.dot_dimension_numbers<[1], [0], [0], [1], [0, 0, 1, 1], [], []>} : vector<8x32xbf16>, vector<32x64xbf16>, vector<8x64xf32> -> vector<8x64xf32>
    %188 = vector.broadcast %38 : vector<1x64xf32> to vector<8x64xf32>
    %189 = arith.addf %187, %188 : vector<8x64xf32>
    %cst_55 = arith.constant 0.000000e+00 : f32
    %190 = vector.broadcast %cst_55 : f32 to vector<8x64xf32>
    %191 = arith.maximumf %189, %190 : vector<8x64xf32>
    %192 = arith.truncf %191 : vector<8x64xf32> to vector<8x64xbf16>
    %c32_56 = arith.constant 32 : index
    %c0_57 = arith.constant 0 : index
    %193 = vector.load %arg3[%c32_56, %c0_57] : memref<96x320xbf16, #tpu.memory_space<vmem>>, vector<64x32xbf16>
    %cst_58 = arith.constant dense<0.000000e+00> : vector<8x32xf32>
    %194 = tpu.matmul %192, %193, %cst_58 {dimension_numbers = #tpu.dot_dimension_numbers<[1], [0], [0], [1], [0, 0, 1, 1], [], []>} : vector<8x64xbf16>, vector<64x32xbf16>, vector<8x32xf32> -> vector<8x32xf32>
    %195 = vector.broadcast %37 : vector<1x32xf32> to vector<8x32xf32>
    %196 = arith.addf %194, %195 : vector<8x32xf32>
    %197 = arith.addf %196, %184 : vector<8x32xf32>
    %cst_59 = arith.constant dense<0.000000e+00> : vector<8xf32>
    %198 = vector.multi_reduction <add>, %197, %cst_59 [1] : vector<8x32xf32> to vector<8xf32>
    %199 = vector.shape_cast %198 : vector<8xf32> to vector<8x1xf32>
    %cst_60 = arith.constant 3.200000e+01 : f32
    %200 = vector.broadcast %cst_60 : f32 to vector<8x1xf32>
    %201 = arith.divf %199, %200 : vector<8x1xf32>
    %202 = vector.broadcast %201 : vector<8x1xf32> to vector<8x32xf32>
    %203 = arith.subf %197, %202 : vector<8x32xf32>
    %204 = arith.mulf %203, %203 : vector<8x32xf32>
    %cst_61 = arith.constant dense<0.000000e+00> : vector<8xf32>
    %205 = vector.multi_reduction <add>, %204, %cst_61 [1] : vector<8x32xf32> to vector<8xf32>
    %206 = vector.shape_cast %205 : vector<8xf32> to vector<8x1xf32>
    %cst_62 = arith.constant 3.200000e+01 : f32
    %207 = vector.broadcast %cst_62 : f32 to vector<8x1xf32>
    %208 = arith.divf %206, %207 : vector<8x1xf32>
    %209 = vector.broadcast %201 : vector<8x1xf32> to vector<8x32xf32>
    %210 = arith.subf %197, %209 : vector<8x32xf32>
    %cst_63 = arith.constant 9.99999974E-6 : f32
    %211 = vector.broadcast %cst_63 : f32 to vector<8x1xf32>
    %212 = arith.addf %208, %211 : vector<8x1xf32>
    %213 = math.rsqrt %212 : vector<8x1xf32>
    %214 = vector.broadcast %213 : vector<8x1xf32> to vector<8x32xf32>
    %215 = arith.mulf %210, %214 : vector<8x32xf32>
    %216 = vector.broadcast %35 : vector<1x32xf32> to vector<8x32xf32>
    %217 = arith.mulf %215, %216 : vector<8x32xf32>
    %218 = vector.broadcast %36 : vector<1x32xf32> to vector<8x32xf32>
    %219 = arith.addf %217, %218 : vector<8x32xf32>
    %220 = vector.extract_strided_slice %219 {offsets = [0, 0], sizes = [2, 32], strides = [1, 1]} : vector<8x32xf32> to vector<2x32xf32>
    %221 = vector.extract_strided_slice %219 {offsets = [2, 0], sizes = [2, 32], strides = [1, 1]} : vector<8x32xf32> to vector<2x32xf32>
    %222 = vector.extract_strided_slice %219 {offsets = [4, 0], sizes = [2, 32], strides = [1, 1]} : vector<8x32xf32> to vector<2x32xf32>
    %223 = vector.extract_strided_slice %219 {offsets = [6, 0], sizes = [2, 32], strides = [1, 1]} : vector<8x32xf32> to vector<2x32xf32>
    %224 = tpu.concatenate %220, %221, %222, %223 in 1 : vector<2x32xf32>, vector<2x32xf32>, vector<2x32xf32>, vector<2x32xf32> -> vector<2x128xf32>
    %c0_64 = arith.constant 0 : index
    %c0_65 = arith.constant 0 : index
    %c0_66 = arith.constant 0 : index
    %225 = vector.load %arg5[%c0_64, %c0_65, %c0_66] : memref<1x2x128xf32, #tpu.memory_space<vmem>>, vector<1x2x128xf32>
    %226 = vector.shape_cast %225 : vector<1x2x128xf32> to vector<2x128xf32>
    %227 = vector.shape_cast %224 : vector<2x128xf32> to vector<1x2x128xf32>
    tpu.vector_store %arg5[%c0_64, %c0_65, %c0_66], %227 {strides = array<i32>} : memref<1x2x128xf32, #tpu.memory_space<vmem>>, vector<1x2x128xf32>,
    return
  }
  func.func @transform_0(%arg0: i32, %arg1: memref<2xi32, #tpu.memory_space<smem>>) -> (i32, i32, i32) {
    %c0_i32 = arith.constant 0 : i32
    %c0_i32_0 = arith.constant 0 : i32
    %c0_i32_1 = arith.constant 0 : i32
    return %arg0, %c0_i32, %c0_i32_0 : i32, i32, i32
  }
  func.func @transform_1(%arg0: i32, %arg1: memref<2xi32, #tpu.memory_space<smem>>) -> (i32, i32) {
    %c0_i32 = arith.constant 0 : i32
    %c0_i32_0 = arith.constant 0 : i32
    %c0_i32_1 = arith.constant 0 : i32
    return %c0_i32, %c0_i32_0 : i32, i32
  }
  func.func @transform_2(%arg0: i32, %arg1: memref<2xi32, #tpu.memory_space<smem>>) -> (i32, i32) {
    %c0_i32 = arith.constant 0 : i32
    %c0_i32_0 = arith.constant 0 : i32
    %c0_i32_1 = arith.constant 0 : i32
    return %c0_i32, %c0_i32_0 : i32, i32
  }
  func.func @transform_3(%arg0: i32, %arg1: memref<2xi32, #tpu.memory_space<smem>>) -> (i32, i32, i32) {
    %c0_i32 = arith.constant 0 : i32
    %c0_i32_0 = arith.constant 0 : i32
    %c0_i32_1 = arith.constant 0 : i32
    return %arg0, %c0_i32, %c0_i32_0 : i32, i32, i32
  }
}

</mosaic_0001>

<bundles_post_ra>
// kernel: tpu_custom_call.1
= control target key start
LH: loop header
LB: loop body
LE: loop exit
PB: predicated region body
PF: predicated region fallthrough
CT: control target
= control target key end

     0   :  { %s1776_s15 = smov [#allocation3]   ;;  %s2240_s0 = inlined_call_operand.hbm [shape: s32[2], index: 0, kind: input, shape index: {}]   ;;  %s2241_s1 = inlined_call_operand.hbm [shape: f32[2,16,32], index: 1, kind: input, shape index: {}]   ;;  %s2242_s2 = inlined_call_operand.hbm [shape: bf16[96,320], index: 2, kind: input, shape index: {}]   ;;  %s2243_s3 = inlined_call_operand.hbm [shape: f32[8,128], index: 3, kind: input, shape index: {}]   ;;  %s2244_s4 = inlined_call_operand.hbm [shape: f32[2,2,128], index: 4, kind: output, shape index: {}]  }
   0x1   :  { %10 = dma.hbm_to_smem %s2240_s0, 16, %s1776_s15, [#allocation2] }
   0x2   :  { %1746 = dma.done.wait [#allocation2], 16 }
   0x3   :  { %1747 = vsyncadd [#allocation2], 4294967280 }
   0x4   :  { %12 = sfence }
   0x5   :  { %13 = vsyncpa [#allocation5], 0 }
   0x6   :  { %15 = vsyncpa [#allocation5 + $0x1], 0 }
   0x7   :  { %16 = vsyncpa [#allocation8], 0 }
   0x8   :  { %17 = vsyncpa [#allocation6], 0 }
   0x9   :  { %19 = vsyncpa [#allocation6 + $0x1], 0  ;;  %s1824_s18 = smov 0   ;;  %s1826_s19 = smov 0  }
   0xa   :  { %s1828_s20 = smov 0   ;;  %s1830_s21 = smov 0  }
   0xb LB: > { %s1845_s0 = sadd.s32 4294967295, %s1774_s21   ;;  %s1304_s22 = sadd.s32 4294967294, %s1774_s21   ;;  %s1774_s21 = sphi %s1830_s21, %s2278_s21   ;;  %s1770_s20 = sphi %s1828_s20, %s2277_s20   ;;  %s1766_s19 = sphi %s1826_s19, %s2276_s19   ;;  %s1762_s18 = sphi %s1824_s18, %s2275_s18  }
   0xc   : > { %p45_p0 = scmp.ne.s32.totalorder %s1766_s19, %s1762_s18  ;;  %p2245_p1 = scmp.eq.s32.totalorder %s1845_s0, 0 }
   0xd   : > { %p117_p3 = scmp.eq.s32.totalorder %s1304_s22, 1  ;;  %p1305_p5 = scmp.ge.s32.totalorder %s1774_s21, 1 }
   0xe   : > { %p1854_p4 = por %p2245_p1, %p45_p0  ;;  %p124_p7 = scmp.lt.s32.totalorder %s1774_s21, 3 }
   0xf   : > { %p1859_p6 = por %p117_p3, %p45_p0  ;;  %s1777_s26 = smov [#allocation7]  }
  0x10   : > { %s2249_s23 = scalar_select %p1854_p4, 1, 0 }
  0x11   : > { %s2250_s24 = scalar_select %p1859_p6, 1, 0 }
  0x12   : > { %p1864_p8 = pnand %p1305_p5, %p124_p7  ;;  %s136_s27 = sshll.u32 %s1777_s26, 4  ;;  %s137_s27 = int_to_ptr.vmem [resolvable:$true] %s136_s27 }
  0x13   : > { %s1778_s29 = smov [#allocation9]   ;;  %s1635_s5 = scalar_lea.vmem %s137_s27, 2304 }
  0x14   : > { %s2251_s25 = scalar_select %p1864_p8, 1, 0 }
  0x15   : > { %p1497_p9 = pneg %p1864_p8  ;;  %s150_s30 = sshll.u32 %s1778_s29, 4  ;;  %s151_s30 = int_to_ptr.vmem [resolvable:$true] %s150_s30 }
  0x16   : > { %p1636_p13 = scmp.ne.s32.totalorder %s137_s27, %s1635_s5  ;;  %p1643_p5 = scmp.lt.s32.totalorder %s137_s27, %s137_s27 }
  0x17   : > { %p1873_p11 = pnand %p1497_p9, %p2245_p1  ;;  %p1644_p7 = scmp.lt.s32.totalorder %s1635_s5, %s1635_s5 }
  0x19   : > { %p1626_p12 = pneg %p1873_p11  ;;  %p1645_p10 = por %p1644_p7, %p1643_p5 }
  0x1b   : > { %p1638_p0 = pnand %p1636_p13, %p1626_p12 }
  0x1d   : > { %p1639_p3 = pneg %p1638_p0 }
  0x1f   : > { %p1646_p9 = pnand %p1645_p10, %p1639_p3 }
  0x21   : > { %1649 = shalt.err (!%p1646_p9)
}
  0x22   : > { %s1779_s6 = smov 192   ;;  %s1780_s7 = smov 12  }
  0x23   : > { %1500 = dma.hbm_to_vmem [thread:$0]  (!%p1873_p11), %s2242_s2, 2304, %s137_s27, [#allocation8], %s1779_s6, %s1779_s6, %s1780_s7  }
  0x24   : > { %s1661_s10 = scalar_lea.vmem %s151_s30, 128  ;;  %p1669_p2 = scmp.lt.s32.totalorder %s151_s30, %s151_s30 }
  0x25   : > { %p1662_p1 = scmp.ne.s32.totalorder %s151_s30, %s1661_s10  ;;  %p1670_p6 = scmp.lt.s32.totalorder %s1661_s10, %s1661_s10 }
  0x27   : > { %p1664_p13 = pnand %p1662_p1, %p1626_p12  ;;  %p1671_p5 = por %p1670_p6, %p1669_p2 }
  0x29   : > { %p1665_p0 = pneg %p1664_p13 }
  0x2b   : > { %p1672_p10 = pnand %p1671_p5, %p1665_p0 }
  0x2d   : > { %1675 = shalt.err (!%p1672_p10)
}
  0x2e   : > { %1503 = dma.hbm_to_vmem [thread:$0]  (!%p1873_p11), %s2243_s3, 128, %s151_s30, [#allocation8]  }
  0x2f   : > { %s1896_s13 = sadd.s32 1, %s1774_s21   ;;  %s32_s14 = sadd.s32 1, %s1770_s20 }
  0x30   : > { %s29_s15 = ssub.s32 %s1774_s21, %s1896_s13  ;;  %p39_p1 = scmp.ne.s32.totalorder %s1770_s20, %s1766_s19 }
  0x31   : > { %p30_p2 = scmp.eq.s32.totalorder %s29_s15, 0  ;;  %p40_p6 = scmp.eq.s32.totalorder %s1774_s21, 0 }
  0x32   : > { %p2253_p12 = scmp.eq.s32.totalorder %s1845_s0, 1  ;;  %p1514_p7 = scmp.lt.s32.totalorder %s1774_s21, 2 }
  0x33   : > { %s1912_s17 = scalar_select %p30_p2, %s1770_s20, %s32_s14  }
  0x34   : > { %p1906_p3 = por %p2253_p12, %p39_p1  ;;  %p41_p9 = por %p40_p6, %p39_p1 }
  0x35   : > { %s161_s22 = sand.u32 1, %s1770_s20   ;;  %s1349_s27 = sshll.u32 %s1774_s21, 8 }
  0x36   : > { %s2254_s16 = scalar_select %p1906_p3, 1, 0 }
  0x37   : > { %s1309_s26 = sshll.u32 %s161_s22, 4  ;;  %s1919_s30 = scalar_lea.hbm %s2241_s1, %s1349_s27 }
  0x38   : > { %s165_s5 = scalar_lea.vmem [#allocation4], %s1309_s26  ;;  %p1923_p11 = pnand %p1514_p7, %p41_p9 }
  0x39   : > { %s172_s6 = sshll.u32 %s165_s5, 4  ;;  %s1927_s8 = scalar_lea.sflag [#allocation5], %s161_s22  ;;  %s1921_s6 = int_to_ptr.vmem [resolvable:$true] %s172_s6 }
  0x3a   : > { %s1676_s9 = scalar_lea.hbm %s1919_s30, 256  ;;  %p1678_p0 = pneg %p1923_p11 }
  0x3b   : > { %p1677_p13 = scmp.ne.s32.totalorder %s1919_s30, %s1676_s9  ;;  %s1681_s12 = scalar_lea.hbm %s2241_s1, 512 }
  0x3c   : > { %p1682_p1 = scmp.lt.s32.totalorder %s1919_s30, %s2241_s1  ;;  %p1683_p2 = scmp.lt.s32.totalorder %s1681_s12, %s1676_s9 }
  0x3d   : > { %p1679_p5 = pnand %p1678_p0, %p1677_p13 }
  0x3e   : > { %p1684_p6 = por %p1683_p2, %p1682_p1 }
  0x3f   : > { %p1680_p10 = pneg %p1679_p5 }
  0x41   : > { %p1685_p12 = pnand %p1684_p6, %p1680_p10 }
  0x43   : > { %1688 = shalt.err (!%p1685_p12)
}
  0x44   : > { %s1689_s22 = scalar_lea.vmem %s1921_s6, 256  ;;  %s1781_s26 = smov [#allocation4]  }
  0x45   : > { %p1690_p7 = scmp.ne.s32.totalorder %s1921_s6, %s1689_s22  ;;  %s1694_s27 = sshll.u32 %s1781_s26, 4  ;;  %s1695_s27 = int_to_ptr.vmem [resolvable:$false] %s1694_s27 }
  0x46   : > { %s1696_s28 = scalar_lea.vmem %s1695_s27, 512  ;;  %p1697_p5 = scmp.lt.s32.totalorder %s1921_s6, %s1695_s27 }
  0x47   : > { %p1692_p9 = pnand %p1690_p7, %p1678_p0  ;;  %p1698_p3 = scmp.lt.s32.totalorder %s1696_s28, %s1689_s22 }
  0x49   : > { %p1693_p13 = pneg %p1692_p9  ;;  %p1699_p4 = por %p1698_p3, %p1697_p5 }
  0x4b   : > { %p1700_p8 = pnand %p1699_p4, %p1693_p13 }
  0x4d   : > { %1703 = shalt.err (!%p1700_p8)
}
  0x4e   : > { %s1782_s29 = smov 128   ;;  %s1783_s5 = smov 8  }
  0x4f   : > { %1507 = dma.hbm_to_vmem [thread:$0]  (!%p1923_p11), %s1919_s30, 256, %s1921_s6, %s1927_s8, %s1782_s29, %s1782_s29, %s1783_s5  }
  0x50   : > { %p2256_p0 = scmp.ne.s32.totalorder %s2251_s25, 0 }
  0x51   : > { %s1951_s9 = sand.u32 (!%p2256_p0), 1, %s1766_s19   ;;  %p2257_p4 = scmp.ne.s32.totalorder (!%p2256_p0), %s2249_s23, 0 }
  0x52   : > { %184 = sbr.rel (%p2256_p0) target bundleno = 4398 (0x112e), region = 32  ;;  %s1313_s10 = sshll.u32 (!%p2256_p0), %s1951_s9, 4 }
  0x53   : > { %s187_s11 = scalar_lea.sflag (!%p2256_p0), [#allocation5], %s1951_s9  ;;  %s1955_s12 = scalar_lea.vmem (!%p2256_p0), [#allocation4], %s1313_s10 }
  0x57   : > { %1749 = dma.done.wait (%p2257_p4), %s187_s11, 256  }
  0x58   : > { %1751 = vsyncadd (%p2257_p4), %s187_s11, 4294967040  ;;  %p2258_p8 = scmp.eq.s32.totalorder %s1845_s0, 0 }
  0x5a   : > { %1753 = dma.done.wait (%p2258_p8), [#allocation8], 2432   ;;  %p2259_p3 = pmov %p2258_p8 }
  0x5b   : > { %v1784_v0 = vmov 0.0   ;;  %vm1785_vm0 = vmmov 0   ;;  %v1968_v1 = vld [vmem:[#allocation7 + $0x18] ss:$12 sps:$4 sm:$0xff]   ;;  %v1970_v2 = vld [vmem:[#allocation7] ss:$12 sps:$4 sm:$0xff]   ;;  %v224_v24 = vlaneseq }
  0x5c   : > { %1755 = vsyncadd (%p2259_p3), [#allocation8], 4294964864  ;;  %1389 = vmatprep.subr.bf16.mxu1 %v1784_v0  ;;  %1393 = vmatprep.mubr.msk.bf16.mxu1 %vm1785_vm0, %v1784_v0  ;;  %v1974_v3 = vld [vmem:[%s1955_s12] sm:$0xff]  ;;  %vm280_vm1 = vcmask 261120   ;;  %s1786_s23 = smov 120   ;;  %s1787_s25 = smov 112  }
  0x5d   : > { %1390 = vmatpush3.bf16.msra.mxu1 %v1968_v1  ;;  %v263_v4 = vpack.c.bf16 %v1974_v3, %v1974_v3  ;;  %s1788_s30 = smov 104   ;;  %s1789_s6 = smov 96   ;;  %vm359_vm2 = vcmask 64512   ;;  %v225_v25 = vshrl.u32 %v224_v24, 7  ;;  %v230_v26 = vand.u32 127, %v224_v24 }
  0x5e   : > { %1391 = vmatprep.subr.bf16.mxu1 %v1784_v0  ;;  %s1790_s7 = smov 64   ;;  %s1791_s8 = smov 16   ;;  %vm545_vm15 = vcmask 130048  }
  0x5f   : > { %v227_v27 = vadd.s32 16, %v225_v25  ;;  %v231_v28 = vshra.s32 %v225_v25, 3  ;;  %v241_v29 = vand.u32 7, %v225_v25  ;;  %v226_v30 = vadd.s32 8, %v225_v25  ;;  %s1792_s14 = smov 8   ;;  %s1793_s15 = smov 24  }
  0x60   : > { %v235_v31 = vshra.s32 %v230_v26, 3  ;;  %v2004_v33 = vand.u32 7, %v230_v26  ;;  %v228_v35 = vadd.s32 24, %v225_v25  ;;  %s1794_s22 = smov 32   ;;  %s253_s26 = sld [smem:[#allocation3 + %s1845_s0]] }
  0x61   : > { %1392 = vmatpush3.bf16.msra.mxu1 %v1970_v2  ;;  %v233_v32 = vshra.s32 %v227_v27, 3  ;;  %v243_v34 = vand.u32 7, %v227_v27  ;;  %v232_v37 = vshra.s32 %v226_v30, 3  ;;  %v242_v38 = vand.u32 7, %v226_v30  ;;  %s1316_s27 = sshll.u32 %s1951_s9, 1  ;;  %s1346_s28 = sshll.u32 %s1845_s0, 5 }
  0x62   : > { %vm2006_vm3 = vcmp.eq.s32.totalorder %v231_v28, %v235_v31  ;;  %vm245_vm4 = vcmp.le.s32.totalorder %v2004_v33, %v241_v29  ;;  %v234_v41 = vshra.s32 %v228_v35, 3  ;;  %v244_v42 = vand.u32 7, %v228_v35  ;;  %s220_s29 = scalar_lea.vmem [#allocation10], %s1316_s27  ;;  %p2272_p10 = scmp.ne.s32.totalorder %s2254_s16, 0 }
  0x63   : > { %vm2011_vm5 = vcmp.eq.s32.totalorder %v233_v32, %v235_v31  ;;  %vm2016_vm6 = vcmp.le.s32.totalorder %v2004_v33, %v243_v34  ;;  %vm249_vm7 = vmand %vm2006_vm3, %vm245_vm4  ;;  %vm2022_vm8 = vcmp.eq.s32.totalorder %v232_v37, %v235_v31  ;;  %vm246_vm9 = vcmp.le.s32.totalorder %v2004_v33, %v242_v38  ;;  %v2057_v34 = vld [vmem:[#allocation7 + $0x1c] ss:$12 sps:$4 sm:$0xff]   ;;  %v2063_v38 = vld [vmem:[#allocation7 + $0x4] ss:$12 sps:$4 sm:$0xff]   ;;  %s1215_s5 = sshll.u32 %s220_s29, 4  ;;  %s1795_s0 = smov [#allocation10]   ;;  %s1216_s5 = int_to_ptr.vmem [resolvable:$true] %s1215_s5 }
  0x64   : > { %1394 = vmatmul.mubr.msk.bf16.vlgmr.msra.gmra.mxu1 %vm280_vm1, %v263_v4  ;;  %vm251_vm10 = vmand %vm2011_vm5, %vm2016_vm6  ;;  %vm2031_vm11 = vcmp.eq.s32.totalorder %v234_v41, %v235_v31  ;;  %vm248_vm12 = vcmp.le.s32.totalorder %v2004_v33, %v244_v42  ;;  %vm547_vm4 = vcmask 195584  }
  0x65   : > { %vm250_vm13 = vmand %vm2022_vm8, %vm246_vm9 }
  0x66   : > { %vm252_vm14 = vmand %vm2031_vm11, %vm248_vm12 }
 0x124   : > { %v318_v5 = vpop.f32.mrf.mxu1 }
 0x125   : > { %342 = vrot.lane.b32.xlu1 %v318_v5, %s1786_s23  ;;  %345 = vrot.lane.b32.xlu0 %v318_v5, %s1787_s25  ;;  %v328_v14 = vmul.f32 0.35355338, %v318_v5 }
 0x126   : > { %v1395_v6 = vpop.f32.mrf.mxu1 }
 0x128   : > { %v321_v7 = vpop.f32.mrf.mxu1 }
 0x129   : > { %348 = vrot.lane.b32.xlu0 %v318_v5, %s1788_s30 }
 0x12a   : > { %v1396_v8 = vpop.f32.mrf.mxu1 }
 0x197   : > { %v343_v9 = vpop.permute.xlu1 %342  ;;  %v346_v10 = vpop.permute.xlu0 %345 }
 0x198   : > { %v1984_v11 = vpack.c.bf16 %v343_v9, %v318_v5 }
 0x19a   : > { %355 = vrot.lane.b32.xlu0 %v1984_v11, %s1789_s6 }
 0x19b   : > { %v349_v12 = vpop.permute.xlu0 %348 }
 0x19c   : > { %v1988_v13 = vpack.c.bf16 %v349_v12, %v346_v10 }
 0x19e   : > { %357 = vrot.lane.b32.xlu1 %v1988_v13, %s1789_s6  ;;  %333 = vrot.lane.b32.xlu0 %v328_v14, %s1787_s25 }
 0x1a2   : > { %330 = vrot.lane.b32.xlu1 %v328_v14, %s1786_s23 }
 0x1a6   : > { %336 = vrot.lane.b32.xlu1 %v328_v14, %s1788_s30 }
 0x20c   : > { %v356_v17 = vpop.permute.xlu0 %355 }
 0x20d   : > { %v367_v20 = vsel %vm359_vm2, %v356_v17, 0 }
 0x210   : > { %v358_v15 = vpop.permute.xlu1 %357  ;;  %v334_v22 = vpop.permute.xlu0 %333 }
 0x211   : > { %v370_v16 = vsel %vm359_vm2, %v358_v15, 0  ;;  %1481 = vmatprep.subr.msk.bf16.mxu1 %vm359_vm2, %v358_v15 }
 0x212   : > { %1398 = vmatpush3.bf16.xpose.msra.mxu1 %v370_v16 }
 0x213   : > { %1482 = vmatprep.subr.msk.bf16.mxu1 %vm359_vm2, %v356_v17 }
 0x214   : > { %v331_v18 = vpop.permute.xlu1 %330 }
 0x215   : > { %v339_v19 = vpack.c.bf16 %v331_v18, %v328_v14 }
 0x217   : > { %1401 = vmatprep.mubr.msk.bf16.mxu1 %vm359_vm2, %v339_v19 }
 0x218   : > { %v337_v21 = vpop.permute.xlu1 %336 }
 0x219   : > { %v340_v23 = vpack.c.bf16 %v337_v21, %v334_v22 }
 0x21a   : > { %1400 = vmatpush3.bf16.xpose.msra.mxu1 %v367_v20 }
 0x21b   : > { %1421 = vmatprep.subr.bf16.mxu1 %v1784_v0 }
 0x221   : > { %1402 = vmatmul.mubr.msk.bf16.vlgmr.msra.gmra.mxu1 %vm359_vm2, %v340_v23 }
 0x222   : > { %1425 = vmatprep.mubr.msk.bf16.mxu1 %vm1785_vm0, %v1784_v0 }
 0x2e1   : > { %v1403_v43 = vpop.f32.mrf.mxu1 }
 0x2e2   : > { %v423_v50 = vsel %vm251_vm10, %v1403_v43, -1000000.0 }
 0x2e3   : > { %v406_v45 = vpop.f32.mrf.mxu1  ;;  %v431_v53 = vsel %vm280_vm1, %v423_v50, -inf }
 0x2e4   : > { %v421_v46 = vsel %vm249_vm7, %v406_v45, -1000000.0 }
 0x2e5   : > { %v1404_v48 = vpop.f32.mrf.mxu1  ;;  %v425_v49 = vsel %vm280_vm1, %v421_v46, -inf }
 0x2e6   : > { %426 = vmax.xlane.f32.xlu0 %v425_v49  ;;  %v424_v55 = vsel %vm252_vm14, %v1404_v48, -1000000.0 }
 0x2e7   : > { %v409_v51 = vpop.f32.mrf.mxu1  ;;  %v434_v56 = vsel %vm280_vm1, %v424_v55, -inf }
 0x2e8   : > { %v422_v52 = vsel %vm250_vm13, %v409_v51, -1000000.0 }
 0x2e9   : > { %v428_v54 = vsel %vm280_vm1, %v422_v52, -inf }
 0x2ea   : > { %432 = vmax.xlane.f32.xlu0 %v431_v53  ;;  %429 = vmax.xlane.f32.xlu1 %v428_v54 }
 0x2ee   : > { %435 = vmax.xlane.f32.xlu0 %v434_v56 }
 0x36f   : > { %v427_v57 = vpop.xlane.xlu0 %426 }
 0x370   : > { %v437_v58 = vsub.f32 %v421_v46, %v427_v57 }
 0x372   : > { %v441_v62 = vmul.f32 1.442695, %v437_v58 }
 0x373   : > { %v433_v59 = vpop.xlane.xlu0 %432  ;;  %v430_v60 = vpop.xlane.xlu1 %429 }
 0x374   : > { %v439_v61 = vsub.f32 %v423_v50, %v433_v59  ;;  %v438_v4 = vsub.f32 %v422_v52, %v430_v60  ;;  %v223_v59 = vld [vmem:[%s1955_s12 + $0x8] sm:$0xff]  ;;  %v2082_v60 = vld [vmem:[#allocation9] ss:$0 sm:$0xff]  ;;  %s2203_s12 = scalar_lea.hbm %s2244_s4, %s1346_s28 }
 0x376   : > { %v445_v63 = vmul.f32 1.442695, %v439_v61  ;;  %v443_v7 = vmul.f32 1.442695, %v438_v4  ;;  %v683_v61 = vpack.c.bf16 %v223_v59, %v223_v59 }
 0x377   : > { %v436_v5 = vpop.xlane.xlu0 %435 }
 0x378   : > { %1578 = vpow2.f32 %v445_v63  ;;  %v440_v6 = vsub.f32 %v424_v55, %v436_v5 }
 0x379   : > { %1580 = vpow2.f32 %v441_v62 }
 0x37a   : > { %v447_v8 = vmul.f32 1.442695, %v440_v6 }
 0x37c   : > { %1582 = vpow2.f32 %v447_v8 }
 0x37d   : > { %1584 = vpow2.f32 %v443_v7 }
 0x385   : > { %v1579_v9 = vpop.eup %1578 }
 0x386   : > { %v455_v10 = vsel %vm280_vm1, %v1579_v9, 0.0  ;;  %v1581_v12 = vpop.eup %1580 }
 0x387   : > { %456 = vadd.xlane.f32.xlu1 %v455_v10  ;;  %v449_v16 = vsel %vm280_vm1, %v1581_v12, 0.0 }
 0x389   : > { %v1583_v14 = vpop.eup %1582 }
 0x38a   : > { %v458_v15 = vsel %vm280_vm1, %v1583_v14, 0.0  ;;  %v1585_v17 = vpop.eup %1584 }
 0x38b   : > { %459 = vadd.xlane.f32.xlu0 %v458_v15  ;;  %450 = vadd.xlane.f32.xlu1 %v449_v16  ;;  %v452_v18 = vsel %vm280_vm1, %v1585_v17, 0.0 }
 0x38f   : > { %453 = vadd.xlane.f32.xlu0 %v452_v18 }
 0x39c   : > { %473 = vrot.lane.b32.xlu1 %v1988_v13, %s1790_s7 }
 0x3a0   : > { %562 = vrot.lane.b32.xlu1 %v2057_v34, %s1790_s7 }
 0x3a5   : > { %471 = vrot.lane.b32.xlu0 %v1984_v11, %s1790_s7 }
 0x410   : > { %v457_v19 = vpop.xlane.xlu1 %456 }
 0x414   : > { %v460_v20 = vpop.xlane.xlu0 %459  ;;  %v451_v21 = vpop.xlane.xlu1 %450 }
 0x415   : > { %1586 = vrcp.f32 %v460_v20 }
 0x416   : > { %1588 = vrcp.f32 %v451_v21 }
 0x417   : > { %1590 = vrcp.f32 %v457_v19 }
 0x418   : > { %v454_v22 = vpop.xlane.xlu0 %453  ;;  %v474_v23 = vpop.permute.xlu1 %473 }
 0x419   : > { %1592 = vrcp.f32 %v454_v22  ;;  %1405 = vmatprep.subr.bf16.mxu0 %v474_v23 }
 0x41a   : > { %1406 = vmatpush3.bf16.msra.mxu0 %v474_v23 }
 0x41c   : > { %v472_v24 = vpop.permute.xlu0 %471  ;;  %v563_v35 = vpop.permute.xlu1 %562 }
 0x41d   : > { %1407 = vmatprep.subr.bf16.mxu0 %v472_v24 }
 0x41e   : > { %1408 = vmatpush3.bf16.msra.mxu0 %v472_v24 }
 0x41f   : > { %1413 = vmatprep.subr.bf16.mxu0 %v1784_v0 }
 0x422   : > { %v1587_v13 = vpop.eup %1586 }
 0x423   : > { %v1589_v25 = vpop.eup %1588  ;;  %v468_v27 = vmul.f32 %v1587_v13, %v1583_v14 }
 0x424   : > { %v1591_v26 = vpop.eup %1590  ;;  %v465_v28 = vmul.f32 %v1589_v25, %v1581_v12 }
 0x425   : > { %v467_v30 = vmul.f32 %v1591_v26, %v1579_v9 }
 0x426   : > { %v1593_v11 = vpop.eup %1592 }
 0x427   : > { %v466_v29 = vmul.f32 %v1593_v11, %v1585_v17  ;;  %v470_v32 = vpack.c.bf16 %v468_v27, %v467_v30 }
 0x429   : > { %v469_v31 = vpack.c.bf16 %v466_v29, %v465_v28 }
 0x42b   : > { %1409 = vmatprep.mubr.msk.bf16.mxu0 %vm280_vm1, %v469_v31 }
 0x42c   : > { %1410 = vmatmul.mubr.msk.bf16.vlgmr.msra.gmra.mxu0 %vm280_vm1, %v470_v32 }
 0x42d   : > { %1417 = vmatprep.mubr.msk.bf16.mxu0 %vm1785_vm0, %v1784_v0  ;;  %1414 = vmatpush3.bf16.msra.mxu0 %v563_v35 }
 0x42e   : > { %1415 = vmatprep.subr.bf16.mxu0 %v1784_v0 }
 0x4ec   : > { %v1411_v37 = vpop.f32.mrf.mxu0 }
 0x4ed   : > { %537 = vrot.lane.b32.xlu0 %v1411_v37, %s1791_s8 }
 0x4ee   : > { %v517_v40 = vpop.f32.mrf.mxu0 }
 0x4f0   : > { %v1412_v41 = vpop.f32.mrf.mxu0 }
 0x4f1   : > { %560 = vrot.lane.b32.xlu0 %v2063_v38, %s1790_s7 }
 0x4f2   : > { %v520_v42 = vpop.f32.mrf.mxu0 }
 0x4f3   : > { %533 = vrot.lane.b32.xlu1 %v520_v42, %s1792_s14 }
 0x4f7   : > { %541 = vrot.lane.b32.xlu1 %v1412_v41, %s1793_s15  ;;  %v254_v41 = vstv %s253_s26 }
 0x4f8   : > { %vm2124_vm6 = vcmp.lt.s32.totalorder %v2004_v33, %v254_v41 }
 0x4f9   : > { %vm256_vm7 = vmand %vm2006_vm3, %vm2124_vm6 }
 0x4fa   : > { %vm258_vm9 = vmand %vm2011_vm5, %vm2124_vm6 }
 0x4fb   : > { %vm257_vm10 = vmand %vm2022_vm8, %vm2124_vm6 }
 0x4fc   : > { %vm259_vm3 = vmand %vm2031_vm11, %vm2124_vm6 }
 0x55f   : > { %v538_v43 = vpop.permute.xlu0 %537 }
 0x563   : > { %v561_v45 = vpop.permute.xlu0 %560 }
 0x564   : > { %1416 = vmatpush3.bf16.msra.mxu0 %v561_v45 }
 0x565   : > { %v534_v46 = vpop.permute.xlu1 %533  ;;  %1429 = vmatprep.subr.bf16.mxu0 %v1784_v0 }
 0x566   : > { %v544_v48 = vsel %vm359_vm2, %v517_v40, %v534_v46 }
 0x567   : > { %v546_v49 = vsel %vm545_vm15, %v544_v48, %v538_v43 }
 0x569   : > { %v542_v50 = vpop.permute.xlu1 %541 }
 0x56a   : > { %v548_v51 = vsel %vm547_vm4, %v546_v49, %v542_v50 }
 0x56b   : > { %v549_v52 = vpack.c.bf16 %v548_v51, %v548_v51 }
 0x56d   : > { %1418 = vmatmul.mubr.msk.bf16.vlgmr.msra.gmra.mxu0 %vm280_vm1, %v549_v52 }
 0x56e   : > { %1430 = vmatpush3.bf16.msra.mxu0 %v2057_v34  ;;  %1433 = vmatprep.mubr.msk.bf16.mxu0 %vm1785_vm0, %v1784_v0 }
 0x56f   : > { %1431 = vmatprep.subr.bf16.mxu0 %v1784_v0 }
 0x572   : > { %1432 = vmatpush3.bf16.msra.mxu0 %v2063_v38 }
 0x575   : > { %1434 = vmatmul.mubr.msk.bf16.vlgmr.msra.gmra.mxu0 %vm280_vm1, %v683_v61 }
 0x62d   : > { %v603_v53 = vpop.f32.mrf.mxu0 }
 0x62e   : > { %v604_v54 = vadd.f32 %v603_v53, %v1974_v3 }
 0x62f   : > { %v1419_v55 = vpop.f32.mrf.mxu0 }
 0x630   : > { %v609_v56 = vsel %vm280_vm1, %v604_v54, 0.0 }
 0x631   : > { %610 = vadd.xlane.f32.xlu1 %v609_v56  ;;  %v606_v57 = vpop.f32.mrf.mxu0 }
 0x633   : > { %v1420_v58 = vpop.f32.mrf.mxu0 }
 0x635   : > { %v723_v6 = vpop.f32.mrf.mxu0 }
 0x637   : > { %v1435_v7 = vpop.f32.mrf.mxu0 }
 0x639   : > { %v726_v8 = vpop.f32.mrf.mxu0 }
 0x642   : > { %629 = vrot.lane.b32.xlu1 %v2082_v60, %s1789_s6 }
 0x646   : > { %634 = vrot.lane.b32.xlu1 %v1970_v2, %s1794_s22  ;;  %v1436_v2 = vpop.f32.mrf.mxu0 }
 0x64a   : > { %749 = vrot.lane.b32.xlu1 %v723_v6, %s1788_s30 }
 0x6ba   : > { %v611_v3 = vpop.xlane.xlu1 %610 }
 0x6bb   : > { %v613_v62 = vmul.f32 0.03125, %v611_v3 }
 0x6bd   : > { %v614_v63 = vsub.f32 %v604_v54, %v613_v62 }
 0x6be   : > { %v630_v10 = vpop.permute.xlu1 %629 }
 0x6bf   : > { %v615_v4 = vmul.f32 %v614_v63, %v614_v63 }
 0x6c1   : > { %v616_v5 = vsel %vm280_vm1, %v615_v4, 0.0 }
 0x6c2   : > { %617 = vadd.xlane.f32.xlu0 %v616_v5 }
 0x6d8   : > { %636 = vrot.lane.b32.xlu0 %v1968_v1, %s1794_s22  ;;  %v635_v1 = vpop.permute.xlu1 %634 }
 0x6dc   : > { %746 = vrot.lane.b32.xlu0 %v723_v6, %s1787_s25  ;;  %v750_v21 = vpop.permute.xlu1 %749 }
 0x6e0   : > { %743 = vrot.lane.b32.xlu0 %v723_v6, %s1786_s23 }
 0x74b   : > { %v618_v9 = vpop.xlane.xlu0 %617 }
 0x74c   : > { %v619_v12 = vmul.f32 0.03125, %v618_v9 }
 0x74e   : > { %v620_v14 = vadd.f32 1e-05, %v619_v12 }
 0x74f   : > { %v637_v15 = vpop.permute.xlu0 %636 }
 0x750   : > { %1594 = vrsqrt.f32 %v620_v14  ;;  %1422 = vmatpush3.bf16.msra.mxu1 %v637_v15 }
 0x751   : > { %1423 = vmatprep.subr.bf16.mxu1 %v1784_v0 }
 0x753   : > { %v747_v22 = vpop.permute.xlu0 %746 }
 0x754   : > { %1424 = vmatpush3.bf16.msra.mxu1 %v635_v1  ;;  %v2102_v23 = vpack.c.bf16 %v750_v21, %v747_v22 }
 0x756   : > { %1483 = vmatprep.subr.msk.bf16.mxu1 %vm359_vm2, %v2102_v23  ;;  %v764_v24 = vsel %vm359_vm2, %v2102_v23, 0 }
 0x757   : > { %v744_v13 = vpop.permute.xlu0 %743 }
 0x758   : > { %v2108_v25 = vpack.c.bf16 %v744_v13, %v723_v6 }
 0x75a   : > { %v761_v26 = vsel %vm359_vm2, %v2108_v25, 0 }
 0x75d   : > { %v1595_v16 = vpop.eup %1594 }
 0x75e   : > { %v622_v17 = vmul.f32 %v1595_v16, %v614_v63 }
 0x760   : > { %v627_v18 = vmul.f32 %v2082_v60, %v622_v17 }
 0x762   : > { %v2097_v19 = vadd.f32 %v630_v10, %v627_v18 }
 0x764   : > { %v633_v20 = vpack.c.bf16 %v2097_v19, %v2097_v19 }
 0x766   : > { %1426 = vmatmul.mubr.msk.bf16.vlgmr.msra.gmra.mxu1 %vm280_vm1, %v633_v20 }
 0x767   : > { %1438 = vmatpush3.bf16.xpose.msra.mxu1 %v764_v24 }
 0x768   : > { %1484 = vmatprep.subr.msk.bf16.mxu1 %vm359_vm2, %v2108_v25 }
 0x76f   : > { %1440 = vmatpush3.bf16.xpose.msra.mxu1 %v761_v26 }
 0x770   : > { %1461 = vmatprep.subr.bf16.mxu1 %v1784_v0 }
 0x826   : > { %v677_v11 = vpop.f32.mrf.mxu1 }
 0x827   : > { %v729_v27 = vmul.f32 0.35355338, %v677_v11 }
 0x828   : > { %v1427_v28 = vpop.f32.mrf.mxu1 }
 0x829   : > { %731 = vrot.lane.b32.xlu1 %v729_v27, %s1786_s23  ;;  %734 = vrot.lane.b32.xlu0 %v729_v27, %s1787_s25  ;;  %s1202_s23 = scalar_lea.sflag [#allocation6], %s1951_s9  ;;  %s1704_s25 = scalar_lea.vmem %s1216_s5, 32 }
 0x82a   : > { %v680_v29 = vpop.f32.mrf.mxu1  ;;  %p1705_p11 = scmp.ne.s32.totalorder %s1216_s5, %s1704_s25 }
 0x82c   : > { %v1428_v30 = vpop.f32.mrf.mxu1  ;;  %p1706_p1 = pnand %p1705_p11, %p2272_p10 }
 0x82d   : > { %737 = vrot.lane.b32.xlu1 %v729_v27, %s1788_s30  ;;  %s1708_s30 = sshll.u32 %s1795_s0, 4  ;;  %s1709_s30 = int_to_ptr.vmem [resolvable:$false] %s1708_s30 }
 0x82e   : > { %p1707_p2 = pneg %p1706_p1  ;;  %p1711_p6 = scmp.lt.s32.totalorder %s1216_s5, %s1709_s30 }
 0x89b   : > { %v732_v31 = vpop.permute.xlu1 %731  ;;  %v735_v35 = vpop.permute.xlu0 %734 }
 0x89c   : > { %v740_v32 = vpack.c.bf16 %v732_v31, %v729_v27 }
 0x89e   : > { %1441 = vmatprep.mubr.msk.bf16.mxu1 %vm359_vm2, %v740_v32 }
 0x89f   : > { %v738_v37 = vpop.permute.xlu1 %737 }
 0x8a0   : > { %v741_v40 = vpack.c.bf16 %v738_v37, %v735_v35 }
 0x8a2   : > { %1442 = vmatmul.mubr.msk.bf16.vlgmr.msra.gmra.mxu1 %vm359_vm2, %v741_v40 }
 0x8a3   : > { %1465 = vmatprep.mubr.msk.bf16.mxu1 %vm1785_vm0, %v1784_v0 }
 0x962   : > { %v1443_v43 = vpop.f32.mrf.mxu1 }
 0x963   : > { %v817_v33 = vsel %vm258_vm9, %v1443_v43, -1000000.0 }
 0x964   : > { %v800_v45 = vpop.f32.mrf.mxu1  ;;  %v825_v50 = vsel %vm280_vm1, %v817_v33, -inf }
 0x965   : > { %v815_v46 = vsel %vm256_vm7, %v800_v45, -1000000.0 }
 0x966   : > { %v1444_v48 = vpop.f32.mrf.mxu1  ;;  %v819_v49 = vsel %vm280_vm1, %v815_v46, -inf }
 0x967   : > { %820 = vmax.xlane.f32.xlu0 %v819_v49  ;;  %v818_v52 = vsel %vm259_vm3, %v1444_v48, -1000000.0 }
 0x968   : > { %v803_v36 = vpop.f32.mrf.mxu1  ;;  %v828_v53 = vsel %vm280_vm1, %v818_v52, -inf }
 0x969   : > { %v816_v39 = vsel %vm257_vm10, %v803_v36, -1000000.0 }
 0x96a   : > { %v822_v51 = vsel %vm280_vm1, %v816_v39, -inf }
 0x96b   : > { %826 = vmax.xlane.f32.xlu0 %v825_v50  ;;  %823 = vmax.xlane.f32.xlu1 %v822_v51 }
 0x96f   : > { %829 = vmax.xlane.f32.xlu0 %v828_v53  ;;  %v1572_v53 = vld [vmem:[#allocation7 + $0x20] ss:$12 sps:$4 sm:$0xff]  }
 0x970   : > { %1462 = vmatpush3.bf16.msra.mxu1 %v1572_v53 }
 0x971   : > { %1463 = vmatprep.subr.bf16.mxu1 %v1784_v0 }
 0x9f0   : > { %v821_v44 = vpop.xlane.xlu0 %820 }
 0x9f1   : > { %v831_v54 = vsub.f32 %v815_v46, %v821_v44  ;;  %v1574_v44 = vld [vmem:[#allocation7 + $0x78] ss:$12 sps:$4 sm:$0xff]  }
 0x9f3   : > { %v835_v58 = vmul.f32 1.442695, %v831_v54  ;;  %v1575_v54 = vld [vmem:[#allocation7 + $0x60] ss:$12 sps:$4 sm:$0xff]  }
 0x9f4   : > { %v827_v55 = vpop.xlane.xlu0 %826  ;;  %v824_v56 = vpop.xlane.xlu1 %823 }
 0x9f5   : > { %v833_v57 = vsub.f32 %v817_v33, %v827_v55  ;;  %v832_v59 = vsub.f32 %v816_v39, %v824_v56 }
 0x9f7   : > { %v839_v47 = vmul.f32 1.442695, %v833_v57  ;;  %v837_v62 = vmul.f32 1.442695, %v832_v59 }
 0x9f8   : > { %v830_v61 = vpop.xlane.xlu0 %829 }
 0x9f9   : > { %1596 = vpow2.f32 %v839_v47  ;;  %v834_v3 = vsub.f32 %v818_v52, %v830_v61 }
 0x9fa   : > { %1598 = vpow2.f32 %v835_v58 }
 0x9fb   : > { %v841_v63 = vmul.f32 1.442695, %v834_v3 }
 0x9fd   : > { %1600 = vpow2.f32 %v841_v63  ;;  %v1576_v63 = vld [vmem:[#allocation7 + $0x48] ss:$12 sps:$4 sm:$0xff]  }
 0x9fe   : > { %1602 = vpow2.f32 %v837_v62 }
 0xa06   : > { %v1597_v4 = vpop.eup %1596 }
 0xa07   : > { %v849_v5 = vsel %vm280_vm1, %v1597_v4, 0.0  ;;  %v1599_v6 = vpop.eup %1598 }
 0xa08   : > { %850 = vadd.xlane.f32.xlu1 %v849_v5  ;;  %v843_v2 = vsel %vm280_vm1, %v1599_v6, 0.0  ;;  %v1339_v5 = vld [vmem:[#allocation9 + $0x1] ss:$0 sm:$0xff] }
 0xa0a   : > { %v1601_v7 = vpop.eup %1600 }
 0xa0b   : > { %v852_v8 = vsel %vm280_vm1, %v1601_v7, 0.0  ;;  %v1603_v9 = vpop.eup %1602 }
 0xa0c   : > { %853 = vadd.xlane.f32.xlu0 %v852_v8  ;;  %844 = vadd.xlane.f32.xlu1 %v843_v2  ;;  %v846_v10 = vsel %vm280_vm1, %v1603_v9, 0.0 }
 0xa10   : > { %847 = vadd.xlane.f32.xlu0 %v846_v10 }
 0xa1d   : > { %869 = vrot.lane.b32.xlu1 %v2102_v23, %s1789_s6 }
 0xa21   : > { %946 = vrot.lane.b32.xlu1 %v2057_v34, %s1794_s22 }
 0xa26   : > { %867 = vrot.lane.b32.xlu0 %v2108_v25, %s1789_s6 }
 0xa91   : > { %v851_v12 = vpop.xlane.xlu1 %850 }
 0xa95   : > { %v854_v14 = vpop.xlane.xlu0 %853  ;;  %v845_v15 = vpop.xlane.xlu1 %844 }
 0xa96   : > { %1604 = vrcp.f32 %v854_v14 }
 0xa97   : > { %1606 = vrcp.f32 %v845_v15 }
 0xa98   : > { %1608 = vrcp.f32 %v851_v12 }
 0xa99   : > { %v848_v1 = vpop.xlane.xlu0 %847  ;;  %v870_v16 = vpop.permute.xlu1 %869 }
 0xa9a   : > { %1610 = vrcp.f32 %v848_v1  ;;  %1445 = vmatprep.subr.bf16.mxu0 %v870_v16 }
 0xa9b   : > { %1446 = vmatpush3.bf16.msra.mxu0 %v870_v16 }
 0xa9d   : > { %v868_v17 = vpop.permute.xlu0 %867  ;;  %v947_v11 = vpop.permute.xlu1 %946 }
 0xa9e   : > { %1447 = vmatprep.subr.bf16.mxu0 %v868_v17 }
 0xa9f   : > { %1448 = vmatpush3.bf16.msra.mxu0 %v868_v17 }
 0xaa0   : > { %1453 = vmatprep.subr.bf16.mxu0 %v1784_v0 }
 0xaa3   : > { %v1605_v34 = vpop.eup %1604 }
 0xaa4   : > { %v1607_v18 = vpop.eup %1606  ;;  %v862_v22 = vmul.f32 %v1605_v34, %v1601_v7 }
 0xaa5   : > { %v1609_v20 = vpop.eup %1608  ;;  %v859_v23 = vmul.f32 %v1607_v18, %v1599_v6  ;;  %v1335_v6 = vld [vmem:[#allocation9 + $0x2] ss:$0 sm:$0xff] }
 0xaa6   : > { %v861_v13 = vmul.f32 %v1609_v20, %v1597_v4  ;;  %v1577_v4 = vld [vmem:[#allocation7 + $0x30] ss:$12 sps:$4 sm:$0xff]  }
 0xaa7   : > { %v1611_v21 = vpop.eup %1610 }
 0xaa8   : > { %v860_v24 = vmul.f32 %v1611_v21, %v1603_v9  ;;  %v864_v26 = vpack.c.bf16 %v862_v22, %v861_v13 }
 0xaaa   : > { %v863_v25 = vpack.c.bf16 %v860_v24, %v859_v23 }
 0xaac   : > { %1449 = vmatprep.mubr.msk.bf16.mxu0 %vm280_vm1, %v863_v25 }
 0xaad   : > { %1450 = vmatmul.mubr.msk.bf16.vlgmr.msra.gmra.mxu0 %vm280_vm1, %v864_v26 }
 0xaae   : > { %1457 = vmatprep.mubr.msk.bf16.mxu0 %vm1785_vm0, %v1784_v0  ;;  %1454 = vmatpush3.bf16.msra.mxu0 %v947_v11 }
 0xaaf   : > { %1455 = vmatprep.subr.bf16.mxu0 %v1784_v0 }
 0xb6d   : > { %v1451_v27 = vpop.f32.mrf.mxu0 }
 0xb6e   : > { %933 = vrot.lane.b32.xlu0 %v1451_v27, %s1791_s8 }
 0xb6f   : > { %v913_v28 = vpop.f32.mrf.mxu0 }
 0xb71   : > { %v1452_v29 = vpop.f32.mrf.mxu0 }
 0xb72   : > { %944 = vrot.lane.b32.xlu0 %v2063_v38, %s1794_s22 }
 0xb73   : > { %v916_v30 = vpop.f32.mrf.mxu0 }
 0xb74   : > { %929 = vrot.lane.b32.xlu1 %v916_v30, %s1792_s14 }
 0xb78   : > { %937 = vrot.lane.b32.xlu1 %v1452_v29, %s1793_s15 }
 0xbe0   : > { %v934_v31 = vpop.permute.xlu0 %933 }
 0xbe4   : > { %v945_v32 = vpop.permute.xlu0 %944 }
 0xbe5   : > { %1456 = vmatpush3.bf16.msra.mxu0 %v945_v32 }
 0xbe6   : > { %v930_v35 = vpop.permute.xlu1 %929  ;;  %1469 = vmatprep.subr.bf16.mxu0 %v1784_v0 }
 0xbe7   : > { %v940_v37 = vsel %vm359_vm2, %v913_v28, %v930_v35  ;;  %vm1198_vm2 = vcmask 785408  }
 0xbe8   : > { %v941_v40 = vsel %vm545_vm15, %v940_v37, %v934_v31 }
 0xbea   : > { %v938_v41 = vpop.permute.xlu1 %937 }
 0xbeb   : > { %v942_v42 = vsel %vm547_vm4, %v941_v40, %v938_v41 }
 0xbec   : > { %v943_v43 = vpack.c.bf16 %v942_v42, %v942_v42 }
 0xbee   : > { %1458 = vmatmul.mubr.msk.bf16.vlgmr.msra.gmra.mxu0 %vm280_vm1, %v943_v43 }
 0xbef   : > { %1477 = vmatprep.mubr.msk.bf16.mxu0 %vm1785_vm0, %v1784_v0  ;;  %1470 = vmatpush3.bf16.msra.mxu0 %v1574_v44  ;;  %vm1120_vm0 = vcmask 523264  }
 0xbf0   : > { %1471 = vmatprep.subr.bf16.mxu0 %v1784_v0 }
 0xbf3   : > { %1472 = vmatpush3.bf16.msra.mxu0 %v1575_v54 }
 0xbf4   : > { %1473 = vmatprep.subr.bf16.mxu0 %v1784_v0 }
 0xbf7   : > { %1474 = vmatpush3.bf16.msra.mxu0 %v1576_v63 }
 0xbf8   : > { %1475 = vmatprep.subr.bf16.mxu0 %v1784_v0 }
 0xbfb   : > { %1476 = vmatpush3.bf16.msra.mxu0 %v1577_v4 }
 0xcae   : > { %v987_v38 = vpop.f32.mrf.mxu0 }
 0xcaf   : > { %v988_v45 = vadd.f32 %v987_v38, %v2097_v19  ;;  %v1573_v19 = vld [vmem:[#allocation7 + $0x8] ss:$12 sps:$4 sm:$0xff]  }
 0xcb0   : > { %v1459_v46 = vpop.f32.mrf.mxu0  ;;  %1464 = vmatpush3.bf16.msra.mxu1 %v1573_v19 }
 0xcb1   : > { %v993_v48 = vsel %vm280_vm1, %v988_v45, 0.0 }
 0xcb2   : > { %994 = vadd.xlane.f32.xlu1 %v993_v48  ;;  %v990_v49 = vpop.f32.mrf.mxu0 }
 0xcb4   : > { %v1460_v33 = vpop.f32.mrf.mxu0 }
 0xcc3   : > { %1010 = vrot.lane.b32.xlu1 %v2082_v60, %s1794_s22 }
 0xcc7   : > { %1117 = vrot.lane.b32.xlu1 %v1339_v5, %s1790_s7 }
 0xd3b   : > { %v995_v36 = vpop.xlane.xlu1 %994 }
 0xd3c   : > { %v996_v39 = vmul.f32 0.03125, %v995_v36 }
 0xd3e   : > { %v997_v50 = vsub.f32 %v988_v45, %v996_v39 }
 0xd3f   : > { %v1011_v61 = vpop.permute.xlu1 %1010 }
 0xd40   : > { %v998_v51 = vmul.f32 %v997_v50, %v997_v50 }
 0xd42   : > { %v999_v52 = vsel %vm280_vm1, %v998_v51, 0.0 }
 0xd43   : > { %1000 = vadd.xlane.f32.xlu0 %v999_v52  ;;  %v1118_v15 = vpop.permute.xlu1 %1117 }
 0xd59   : > { %1006 = vrot.lane.b32.xlu0 %v2082_v60, %s1790_s7 }
 0xdcc   : > { %v1001_v55 = vpop.xlane.xlu0 %1000 }
 0xdcd   : > { %v1002_v56 = vmul.f32 0.03125, %v1001_v55 }
 0xdcf   : > { %v1003_v57 = vadd.f32 1e-05, %v1002_v56 }
 0xdd0   : > { %v1007_v47 = vpop.permute.xlu0 %1006 }
 0xdd1   : > { %1612 = vrsqrt.f32 %v1003_v57 }
 0xdde   : > { %v1613_v58 = vpop.eup %1612 }
 0xddf   : > { %v1005_v59 = vmul.f32 %v1613_v58, %v997_v50 }
 0xde1   : > { %v1009_v3 = vmul.f32 %v1007_v47, %v1005_v59 }
 0xde3   : > { %v1013_v60 = vadd.f32 %v1011_v61, %v1009_v3 }
 0xde5   : > { %v1014_v62 = vpack.c.bf16 %v1013_v60, %v1013_v60 }
 0xde7   : > { %1466 = vmatmul.mubr.msk.bf16.vlgmr.msra.gmra.mxu1 %vm280_vm1, %v1014_v62 }
 0xea7   : > { %v1072_v7 = vpop.f32.mrf.mxu1 }
 0xea8   : > { %v1073_v8 = vadd.f32 %v1335_v6, %v1072_v7 }
 0xea9   : > { %v1467_v2 = vpop.f32.mrf.mxu1 }
 0xeaa   : > { %v1078_v9 = vmax.f32 %v1073_v8, 0.0 }
 0xeab   : > { %v1075_v10 = vpop.f32.mrf.mxu1 }
 0xeac   : > { %v1079_v12 = vpack.c.bf16 %v1078_v9, %v1078_v9 }
 0xead   : > { %v1468_v14 = vpop.f32.mrf.mxu1 }
 0xeae   : > { %1478 = vmatmul.mubr.msk.bf16.vlgmr.msra.gmra.mxu0 %vm1120_vm0, %v1079_v12 }
 0xf6e   : > { %v1158_v1 = vpop.f32.mrf.mxu0 }
 0xf6f   : > { %v1159_v16 = vadd.f32 %v1158_v1, %v1118_v15 }
 0xf70   : > { %v1479_v0 = vpop.f32.mrf.mxu0 }
 0xf71   : > { %v1164_v17 = vadd.f32 %v1159_v16, %v1013_v60 }
 0xf72   : > { %v1161_v34 = vpop.f32.mrf.mxu0 }
 0xf73   : > { %v1165_v18 = vsel %vm280_vm1, %v1164_v17, 0.0 }
 0xf74   : > { %1166 = vadd.xlane.f32.xlu0 %v1165_v18  ;;  %v1480_v20 = vpop.f32.mrf.mxu0 }
 0xf8a   : > { %1179 = vrot.lane.b32.xlu0 %v1339_v5, %s1789_s6 }
 0xffd   : > { %v1167_v21 = vpop.xlane.xlu0 %1166 }
 0xffe   : > { %v1168_v22 = vmul.f32 0.03125, %v1167_v21 }
0x1000   : > { %v1169_v23 = vsub.f32 %v1164_v17, %v1168_v22 }
0x1001   : > { %v1180_v29 = vpop.permute.xlu0 %1179 }
0x1002   : > { %v1170_v24 = vmul.f32 %v1169_v23, %v1169_v23 }
0x1004   : > { %v1171_v13 = vsel %vm280_vm1, %v1170_v24, 0.0 }
0x1005   : > { %1172 = vadd.xlane.f32.xlu1 %v1171_v13 }
0x108e   : > { %v1173_v25 = vpop.xlane.xlu1 %1172 }
0x108f   : > { %v1174_v26 = vmul.f32 0.03125, %v1173_v25 }
0x1091   : > { %v1175_v11 = vadd.f32 1e-05, %v1174_v26 }
0x1093   : > { %1614 = vrsqrt.f32 %v1175_v11 }
0x10a0   : > { %v1615_v27 = vpop.eup %1614 }
0x10a1   : > { %v1177_v28 = vmul.f32 %v1615_v27, %v1169_v23 }
0x10a3   : > { %v1178_v30 = vmul.f32 %v1339_v5, %v1177_v28 }
0x10a5   : > { %v1182_v31 = vadd.f32 %v1180_v29, %v1178_v30 }
0x10a7   : > { %v1188_v32 = vrot.slane %v1182_v31, 4  ;;  %v1184_v35 = vrot.slane %v1182_v31, 2  ;;  %v1192_v37 = vrot.slane %v1182_v31, 6 }
0x10a9   : > { %1189 = vrot.lane.b32.xlu0 %v1188_v32, %s1790_s7  ;;  %1185 = vrot.lane.b32.xlu1 %v1184_v35, %s1794_s22 }
0x10ad   : > { %1193 = vrot.lane.b32.xlu1 %v1192_v37, %s1789_s6  ;;  %s1710_s6 = scalar_lea.vmem %s1709_s30, 64 }
0x10ae   : > { %p1712_p12 = scmp.lt.s32.totalorder %s1710_s6, %s1704_s25 }
0x10b0   : > { %p1713_p7 = por %p1712_p12, %p1711_p6 }
0x10b2   : > { %p1714_p9 = pnand %p1713_p7, %p1707_p2 }
0x111b   : > { %v1186_v40 = vpop.permute.xlu1 %1185  ;;  %v1190_v41 = vpop.permute.xlu0 %1189 }
0x111c   : > { %v1196_v42 = vsel %vm280_vm1, %v1182_v31, %v1186_v40 }
0x111d   : > { %v1197_v43 = vsel %vm1120_vm0, %v1196_v42, %v1190_v41 }
0x111f   : > { %v1194_v38 = vpop.permute.xlu1 %1193 }
0x1120   : > { %v1199_v45 = vsel %vm1198_vm2, %v1197_v43, %v1194_v38 }
0x1121   : > { %1200 = vst [vmem:[%s220_s29] sm:$0x3] %v1199_v45 }
0x1122   : > { %1717 = shalt.err (!%p1714_p9)
}
0x1123   : > { %s1718_s7 = scalar_lea.hbm %s2203_s12, 32  ;;  %s1722_s14 = scalar_lea.hbm %s2244_s4, 64 }
0x1124   : > { %p1719_p13 = scmp.ne.s32.totalorder %s2203_s12, %s1718_s7  ;;  %p1723_p4 = scmp.lt.s32.totalorder %s2203_s12, %s2244_s4 }
0x1125   : > { %p1724_p8 = scmp.lt.s32.totalorder %s1722_s14, %s1718_s7 }
0x1126   : > { %p1720_p5 = pnand %p1719_p13, %p2272_p10 }
0x1127   : > { %p1725_p3 = por %p1724_p8, %p1723_p4 }
0x1128   : > { %p1721_p0 = pneg %p1720_p5 }
0x112a   : > { %p1726_p11 = pnand %p1725_p3, %p1721_p0 }
0x112c   : > { %1729 = shalt.err (!%p1726_p11)
}
0x112d   : > { %1495 = dma.vmem_to_hbm [thread:$0]  (%p2272_p10), %s1216_s5, 32, %s2203_s12, %s1202_s23  }
0x112e PF: > { %s1227_s26 = sand.u32 1, %s1762_s18   ;;  %p2273_p1 = scmp.ne.s32.totalorder %s2250_s24, 0 }
0x112f   : > { %p2274_p2 = scmp.ge.s32.totalorder %s1774_s21, 2  ;;  %s1228_s27 = scalar_lea.sflag [#allocation6], %s1227_s26 }
0x1131   : > { %p1509_p6 = pnand %p2274_p2, %p2273_p1 }
0x1133   : > { %p1510_p12 = pneg %p1509_p6 }
0x1135   : > { %1757 = dma.done.wait (%p1510_p12), %s1228_s27, 32  }
0x1136   : > { %1759 = vsyncadd (%p1510_p12), %s1228_s27, 4294967264  ;;  %p22_p7 = scmp.ge.s32.totalorder %s1896_s13, 4   ;;  %s2275_s18 = smov %s1766_s19 }
0x1137   : > { %s2276_s19 = smov %s1770_s20  ;;  %s2277_s20 = smov %s1912_s17 }
0x1138   : > { %s2278_s21 = smov %s1896_s13  ;;  %24 = sbr.rel (!%p22_p7) target bundleno = 11 (0xb), region = 85 }
0x113d   :  { %1233 = vsyncpa [#allocation5], 1 }
0x113e   :  { %1235 = vsyncpa [#allocation5 + $0x1], 1 }
0x113f   :  { %1236 = vsyncpa [#allocation8], 1 }
0x1140   :  { %1237 = vsyncpa [#allocation6], 1 }
0x1141   :  { %1239 = vsyncpa [#allocation6 + $0x1], 1 }

</bundles_post_ra>
